<compile_context>
chip_gen: v6e
topology: v6e:2x2x1
jax: 0.10.0
libtpu: 0.0.40
codegen_flags: <defaults>
</compile_context>

<pallas_src>
import functools

import jax
import jax.numpy as jnp
from jax.experimental import pallas as pl
from jax.experimental.pallas import tpu as pltpu


def _round_up(x, m):
    return (x + m - 1) // m * m


def _gcn_conv_kernel(adj_ref, x_ref, wt_ref, b_ref, o_ref, *, compute_dtype):
    """One grid step == one block of GB (padded) graphs.

    adj_ref: (GB, Np, Np)  adjacency, adj[g, dst, src] in {0,1} (bf16 -> exact)
    x_ref:   (GB, Np, Din) node features (already in compute_dtype)
    wt_ref:  (Din, Dp)     Linear weight, pre-transposed, lane-padded, compute_dtype
    b_ref:   (1, Dp)       bias, lane-padded, f32
    o_ref:   (GB, Np, Dp)  output (lane-dense: Dp is a multiple of 128)
    """
    gb, n_p, din = x_ref.shape
    d_p = o_ref.shape[-1]

    adj = adj_ref[...]                                                    # (GB, Np, Np)

    # In-degree + reciprocal: GB*N reciprocals instead of a GB*N*D divide.
    # f32 sum keeps integer degrees exact for any subgraph size.
    deg = jnp.sum(adj.astype(jnp.float32), axis=-1, keepdims=True)        # (GB, Np, 1)
    inv_deg = jnp.where(deg > 0.0, 1.0 / jnp.maximum(deg, 1.0), 0.0)      # (GB, Np, 1)

    # Project FIRST, all GB graphs in ONE MXU matmul (Np % 8 == 0 so the
    # leading-dim merge is a layout no-op).  The N x N aggregation then runs
    # at the (padded) output width Dp.
    xw = jnp.dot(x_ref[...].reshape(gb * n_p, din).astype(compute_dtype),
                 wt_ref[...].astype(compute_dtype),
                 preferred_element_type=jnp.float32)                      # (GB*Np, Dp)
    xw = xw.reshape(gb, n_p, d_p)

    # Batched aggregation over the block of graphs (MXU batched matmul).
    agg = jnp.einsum("gij,gjd->gid",
                     adj.astype(compute_dtype), xw.astype(compute_dtype),
                     preferred_element_type=jnp.float32)                  # (GB, Np, Dp)

    o_ref[...] = (agg * inv_deg + b_ref[...]).astype(o_ref.dtype)


def gcn_conv_batched(adj, x, weight, bias, *,
                     graphs_per_block=8,
                     compute_dtype=jnp.float32,
                     adj_dtype=jnp.bfloat16):
    """Batched SEAL GCNConv.

    adj:    (G, N, N) with adj[g, dst, src] = 1 iff edge src -> dst
    x:      (G, N, Din)
    weight: (Dout, Din)   (nn.Linear weight)
    bias:   (Dout,)
    returns (G, N, Dout)

    graphs_per_block amortizes the per-grid-step overhead across several small
    subgraphs.  compute_dtype=jnp.bfloat16 selects the fast bf16 MXU path on
    v6e/v7x (adjacency stays exact; x / W rounding applies); default f32
    matches the PyTorch module numerics.
    """
    g, n, _ = adj.shape
    din = x.shape[-1]
    dout = weight.shape[0]
    out_dtype = x.dtype

    gb = max(1, min(graphs_per_block, g))
    g_p = _round_up(g, gb)       # pad with all-zero graphs (output = bias, sliced off)
    n_p = _round_up(n, 8)        # sublane-aligned rows
    d_p = _round_up(dout, 128)   # lane-dense output -> unmasked stores

    # Glue / padding (all-zero pads are inert and sliced off at the end).
    adj_p = jnp.pad(adj.astype(adj_dtype),
                    ((0, g_p - g), (0, n_p - n), (0, n_p - n)))
    x_p = jnp.pad(x.astype(compute_dtype), ((0, g_p - g), (0, n_p - n), (0, 0)))
    wt_p = jnp.pad(weight.T.astype(compute_dtype), ((0, 0), (0, d_p - dout)))
    b_p = jnp.pad(bias.astype(jnp.float32), (0, d_p - dout)).reshape(1, d_p)

    kernel = functools.partial(_gcn_conv_kernel, compute_dtype=compute_dtype)

    out_p = pl.pallas_call(
        kernel,
        out_shape=jax.ShapeDtypeStruct((g_p, n_p, d_p), out_dtype),
        grid=(g_p // gb,),
        in_specs=[
            pl.BlockSpec((gb, n_p, n_p), lambda i: (i, 0, 0)),   # adj block
            pl.BlockSpec((gb, n_p, din), lambda i: (i, 0, 0)),   # x block
            pl.BlockSpec((din, d_p), lambda i: (0, 0)),          # W^T (shared)
            pl.BlockSpec((1, d_p), lambda i: (0, 0)),            # bias (shared)
        ],
        out_specs=pl.BlockSpec((gb, n_p, d_p), lambda i: (i, 0, 0)),
        compiler_params=pltpu.CompilerParams(
            dimension_semantics=("parallel",)),   # both TCs on v7x; no-op otherwise
    )(adj_p, x_p, wt_p, b_p)

    return out_p[:g, :n, :dout]


def gcn_conv(adj, x, weight, bias, **kwargs):
    """Module-equivalent single-graph forward.  For the real SEAL workload of
    many subgraphs, prefer gcn_conv_batched."""
    # TODO(synk): a single very large graph (N*N exceeding VMEM) would need a
    # row-tiled + K-tiled accumulator variant; not needed for SEAL subgraphs.
    return gcn_conv_batched(adj[None], x[None], weight, bias,
                            graphs_per_block=1, **kwargs)[0]


if __name__ == "__main__":
    key = jax.random.PRNGKey(0)
    k_adj, k_x, k_w, k_b = jax.random.split(key, 4)

    G, N, IN_DIM, OUT_DIM = 6, 64, 32, 16

    # Random directed subgraphs; adj[g, dst, src] = 1 iff edge src -> dst.
    adj = (jax.random.uniform(k_adj, (G, N, N)) < 0.25).astype(jnp.float32)
    adj = adj.at[0, 0, :].set(0.0)  # force one isolated node (deg == 0 branch)

    x = jax.random.normal(k_x, (G, N, IN_DIM), dtype=jnp.float32)

    # Deterministic nn.Linear(in_dim, out_dim) params: weight (out, in), bias (out,)
    bound = 1.0 / (IN_DIM ** 0.5)
    weight = jax.random.uniform(k_w, (OUT_DIM, IN_DIM), minval=-bound,
                                maxval=bound, dtype=jnp.float32)
    bias = jax.random.uniform(k_b, (OUT_DIM,), minval=-bound, maxval=bound,
                              dtype=jnp.float32)

    # Plain-JAX reference (original op order: mean aggregation, then Linear).
    deg = adj.sum(axis=-1, keepdims=True)
    h_ref = jnp.where(deg > 0, (adj @ x) / jnp.maximum(deg, 1.0), 0.0)
    ref = h_ref @ weight.T + bias

    # f32 compute path, single block of 6 graphs per grid step.
    out = jax.block_until_ready(jax.jit(gcn_conv_batched)(adj, x, weight, bias))
    assert out.shape == (G, N, OUT_DIM)
    assert jnp.allclose(out, ref, atol=1e-4, rtol=1e-4), "f32 path mismatch"

    # Graph-block size that does not divide G (exercises zero-graph padding).
    out_blk = jax.block_until_ready(
        jax.jit(functools.partial(gcn_conv_batched, graphs_per_block=4))(
            adj, x, weight, bias))
    assert jnp.allclose(out_blk, ref, atol=1e-4, rtol=1e-4), "blocked path mismatch"

    # Single-graph (module-equivalent) wrapper.
    out0 = jax.block_until_ready(gcn_conv(adj[0], x[0], weight, bias))
    assert jnp.allclose(out0, ref[0], atol=1e-4, rtol=1e-4), "single-graph mismatch"

    # bf16 MXU fast path (v6e/v7x): same structure, looser tolerance.
    out_bf16 = jax.block_until_ready(
        jax.jit(functools.partial(gcn_conv_batched, compute_dtype=jnp.bfloat16))(
            adj, x, weight, bias))
    assert jnp.allclose(out_bf16, ref, atol=5e-2, rtol=5e-2), "bf16 path mismatch"

    print("KERNEL_OK")
</pallas_src>

<mosaic_0001>
module attributes {stable_mosaic.version = 11 : i64} {
  func.func @_gcn_conv_kernel(%arg0: i32, %arg1: memref<6x64x64xbf16, #tpu.memory_space<vmem>>, %arg2: memref<6x64x32xf32, #tpu.memory_space<vmem>>, %arg3: memref<32x128xf32, #tpu.memory_space<vmem>>, %arg4: memref<1x128xf32, #tpu.memory_space<vmem>>, %arg5: memref<6x64x128xf32, #tpu.memory_space<vmem>>) attributes {dimension_semantics = [#tpu.dimension_semantics<parallel>], iteration_bounds = array<i64: 1>, scalar_prefetch = 0 : i64, scratch_operands = 0 : i64, tpu.core_type = #tpu.core_type<tc>, window_params = [{transform_indices = @transform_0, window_bounds = array<i64: 6, 64, 64>}, {transform_indices = @transform_1, window_bounds = array<i64: 6, 64, 32>}, {pipeline_mode = #tpu.pipeline_mode<synchronous>, transform_indices = @transform_2, window_bounds = array<i64: 32, 128>}, {pipeline_mode = #tpu.pipeline_mode<synchronous>, transform_indices = @transform_3, window_bounds = array<i64: 1, 128>}, {transform_indices = @transform_4, window_bounds = array<i64: 6, 64, 128>}]} {
    %c0 = arith.constant 0 : index
    %c0_0 = arith.constant 0 : index
    %c0_1 = arith.constant 0 : index
    %0 = vector.load %arg1[%c0, %c0_0, %c0_1] : memref<6x64x64xbf16, #tpu.memory_space<vmem>>, vector<6x64x64xbf16>
    %1 = arith.extf %0 : vector<6x64x64xbf16> to vector<6x64x64xf32>
    %cst = arith.constant dense<0.000000e+00> : vector<6x64xf32>
    %2 = vector.multi_reduction <add>, %1, %cst [2] : vector<6x64x64xf32> to vector<6x64xf32>
    %3 = vector.shape_cast %2 : vector<6x64xf32> to vector<6x64x1xf32>
    %cst_2 = arith.constant 0.000000e+00 : f32
    %4 = vector.broadcast %cst_2 : f32 to vector<6x64x1xf32>
    %5 = arith.cmpf ogt, %3, %4 : vector<6x64x1xf32>
    %cst_3 = arith.constant 1.000000e+00 : f32
    %6 = vector.broadcast %cst_3 : f32 to vector<6x64x1xf32>
    %7 = arith.maximumf %3, %6 : vector<6x64x1xf32>
    %cst_4 = arith.constant 1.000000e+00 : f32
    %8 = vector.broadcast %cst_4 : f32 to vector<6x64x1xf32>
    %9 = arith.divf %8, %7 : vector<6x64x1xf32>
    %cst_5 = arith.constant 0.000000e+00 : f32
    %10 = vector.broadcast %cst_5 : f32 to vector<6x64x1xf32>
    %11 = arith.select %5, %9, %10 : vector<6x64x1xi1>, vector<6x64x1xf32>
    %c0_6 = arith.constant 0 : index
    %c0_7 = arith.constant 0 : index
    %c0_8 = arith.constant 0 : index
    %12 = vector.load %arg2[%c0_6, %c0_7, %c0_8] : memref<6x64x32xf32, #tpu.memory_space<vmem>>, vector<6x64x32xf32>
    %13 = vector.shape_cast %12 : vector<6x64x32xf32> to vector<384x32xf32>
    %c0_9 = arith.constant 0 : index
    %c0_10 = arith.constant 0 : index
    %14 = vector.load %arg3[%c0_9, %c0_10] : memref<32x128xf32, #tpu.memory_space<vmem>>, vector<32x128xf32>
    %cst_11 = arith.constant dense<0.000000e+00> : vector<384x128xf32>
    %15 = tpu.matmul %13, %14, %cst_11 {dimension_numbers = #tpu.dot_dimension_numbers<[1], [0], [0], [1], [0, 0, 1, 1], [], []>} : vector<384x32xf32>, vector<32x128xf32>, vector<384x128xf32> -> vector<384x128xf32>
    %16 = vector.shape_cast %15 : vector<384x128xf32> to vector<6x64x128xf32>
    %17 = arith.extf %0 : vector<6x64x64xbf16> to vector<6x64x64xf32>
    "tpu.trace_start"() <{level = 10 : i32, message = "gij,gjd->gid"}> : () -> ()
    %cst_12 = arith.constant dense<0.000000e+00> : vector<6x64x128xf32>
    %18 = tpu.matmul %17, %16, %cst_12 {dimension_numbers = #tpu.dot_dimension_numbers<[2], [1], [1], [2], [0, 0, 0, 1, 1, 2], [0], [0]>} : vector<6x64x64xf32>, vector<6x64x128xf32>, vector<6x64x128xf32> -> vector<6x64x128xf32>
    "tpu.trace_stop"() : () -> ()
    %19 = vector.broadcast %11 : vector<6x64x1xf32> to vector<6x64x128xf32>
    %20 = arith.mulf %18, %19 : vector<6x64x128xf32>
    %c0_13 = arith.constant 0 : index
    %c0_14 = arith.constant 0 : index
    %21 = vector.load %arg4[%c0_13, %c0_14] : memref<1x128xf32, #tpu.memory_space<vmem>>, vector<1x128xf32>
    %22 = vector.shape_cast %21 : vector<1x128xf32> to vector<1x1x128xf32>
    %23 = vector.broadcast %22 : vector<1x1x128xf32> to vector<6x64x128xf32>
    %24 = arith.addf %20, %23 : vector<6x64x128xf32>
    %c0_15 = arith.constant 0 : index
    %c0_16 = arith.constant 0 : index
    %c0_17 = arith.constant 0 : index
    %25 = vector.load %arg5[%c0_15, %c0_16, %c0_17] : memref<6x64x128xf32, #tpu.memory_space<vmem>>, vector<6x64x128xf32>
    tpu.vector_store %arg5[%c0_15, %c0_16, %c0_17], %24 {strides = array<i32>} : memref<6x64x128xf32, #tpu.memory_space<vmem>>, vector<6x64x128xf32>,
    return
  }
  func.func @transform_0(%arg0: i32) -> (i32, i32, i32) {
    %c0_i32 = arith.constant 0 : i32
    %c0_i32_0 = arith.constant 0 : i32
    %c0_i32_1 = arith.constant 0 : i32
    return %arg0, %c0_i32, %c0_i32_0 : i32, i32, i32
  }
  func.func @transform_1(%arg0: i32) -> (i32, i32, i32) {
    %c0_i32 = arith.constant 0 : i32
    %c0_i32_0 = arith.constant 0 : i32
    %c0_i32_1 = arith.constant 0 : i32
    return %arg0, %c0_i32, %c0_i32_0 : i32, i32, i32
  }
  func.func @transform_2(%arg0: i32) -> (i32, i32) {
    %c0_i32 = arith.constant 0 : i32
    %c0_i32_0 = arith.constant 0 : i32
    %c0_i32_1 = arith.constant 0 : i32
    return %c0_i32, %c0_i32_0 : i32, i32
  }
  func.func @transform_3(%arg0: i32) -> (i32, i32) {
    %c0_i32 = arith.constant 0 : i32
    %c0_i32_0 = arith.constant 0 : i32
    %c0_i32_1 = arith.constant 0 : i32
    return %c0_i32, %c0_i32_0 : i32, i32
  }
  func.func @transform_4(%arg0: i32) -> (i32, i32, i32) {
    %c0_i32 = arith.constant 0 : i32
    %c0_i32_0 = arith.constant 0 : i32
    %c0_i32_1 = arith.constant 0 : i32
    return %arg0, %c0_i32, %c0_i32_0 : i32, i32, i32
  }
}

</mosaic_0001>

<bundles_post_ra>
// kernel: gcn_conv_batched.1
= control target key start
LH: loop header
LB: loop body
LE: loop exit
PB: predicated region body
PF: predicated region fallthrough
CT: control target
= control target key end

     0   :  { %vm550_vm0 = vcmask 261120   ;;  %vm113_vm1 = vcmask 523264   ;;  %s3723_s2 = inlined_call_operand.vmem [shape: f32[32,128], index: 2, kind: input, shape index: {}]   ;;  %s3724_s1 = inlined_call_operand.vmem [shape: f32[6,64,32], index: 1, kind: input, shape index: {}]   ;;  %s3725_s0 = inlined_call_operand.vmem [shape: bf16[6,64,64], index: 0, kind: input, shape index: {}]   ;;  %s3726_s3 = inlined_call_operand.vmem [shape: f32[1,128], index: 3, kind: input, shape index: {}]   ;;  %s3727_s4 = inlined_call_operand.vmem [shape: f32[6,64,128], index: 4, kind: output, shape index: {}]  }
   0x1   :  { %v549_v0 = vld [vmem:[%s3723_s2 + $0x18] sm:$0xff]  ;;  %v548_v1 = vld [vmem:[%s3723_s2 + $0x10] sm:$0xff]  ;;  %v498_v2 = vld [vmem:[%s3724_s1] sm:$0xff] }
   0x2   :  { %2293 = vmatprep.subr.mxu0 %v549_v0  ;;  %v547_v3 = vld [vmem:[%s3723_s2 + $0x8] sm:$0xff]  ;;  %2301 = vmatprep.mubr.msk.f32.mxu0 %vm550_vm0, %v498_v2  ;;  %v546_v4 = vld [vmem:[%s3723_s2] sm:$0xff]  ;;  %v500_v6 = vld [vmem:[%s3724_s1 + $0x10] sm:$0xff] }
   0x3   :  { %2294 = vmatpush3.msra.mxu0 %v549_v0  ;;  %v499_v5 = vld [vmem:[%s3724_s1 + $0x8] sm:$0xff]  ;;  %v501_v7 = vld [vmem:[%s3724_s1 + $0x18] sm:$0xff]  ;;  %v502_v8 = vld [vmem:[%s3724_s1 + $0x20] sm:$0xff] }
   0x4   :  { %2295 = vmatprep.subr.mxu0 %v548_v1  ;;  %v503_v9 = vld [vmem:[%s3724_s1 + $0x28] sm:$0xff]  ;;  %v504_v10 = vld [vmem:[%s3724_s1 + $0x30] sm:$0xff]  ;;  %v505_v11 = vld [vmem:[%s3724_s1 + $0x38] sm:$0xff] }
   0x5   :  { %2296 = vmatpush3.msra.mxu0 %v548_v1  ;;  %v506_v12 = vld [vmem:[%s3724_s1 + $0x40] sm:$0xff]  ;;  %v507_v13 = vld [vmem:[%s3724_s1 + $0x48] sm:$0xff]  ;;  %v508_v14 = vld [vmem:[%s3724_s1 + $0x50] sm:$0xff] }
   0x6   :  { %2297 = vmatprep.subr.mxu0 %v547_v3  ;;  %v509_v15 = vld [vmem:[%s3724_s1 + $0x58] sm:$0xff]  ;;  %v510_v16 = vld [vmem:[%s3724_s1 + $0x60] sm:$0xff]  ;;  %v511_v17 = vld [vmem:[%s3724_s1 + $0x68] sm:$0xff] }
   0x7   :  { %2298 = vmatpush3.msra.mxu0 %v547_v3  ;;  %v512_v18 = vld [vmem:[%s3724_s1 + $0x70] sm:$0xff]  ;;  %v513_v19 = vld [vmem:[%s3724_s1 + $0x78] sm:$0xff]  ;;  %v514_v20 = vld [vmem:[%s3724_s1 + $0x80] sm:$0xff] }
   0x8   :  { %2299 = vmatprep.subr.mxu0 %v546_v4  ;;  %v515_v21 = vld [vmem:[%s3724_s1 + $0x88] sm:$0xff]  ;;  %v516_v22 = vld [vmem:[%s3724_s1 + $0x90] sm:$0xff]  ;;  %v517_v23 = vld [vmem:[%s3724_s1 + $0x98] sm:$0xff] }
   0x9   :  { %2300 = vmatpush3.msra.mxu0 %v546_v4  ;;  %v518_v24 = vld [vmem:[%s3724_s1 + $0xa0] sm:$0xff]  ;;  %v519_v25 = vld [vmem:[%s3724_s1 + $0xa8] sm:$0xff]  ;;  %v520_v26 = vld [vmem:[%s3724_s1 + $0xb0] sm:$0xff] }
   0xa   :  { %2302 = vmatmul.mubr.msk.f32.vlgmr.msra.gmra.mxu0 %vm550_vm0, %v499_v5  ;;  %v521_v27 = vld [vmem:[%s3724_s1 + $0xb8] sm:$0xff]  ;;  %v522_v28 = vld [vmem:[%s3724_s1 + $0xc0] sm:$0xff]  ;;  %v523_v29 = vld [vmem:[%s3724_s1 + $0xc8] sm:$0xff] }
   0xb   :  { %2304 = vmatprep.mubr.msk.f32.mxu0 %vm550_vm0, %v500_v6  ;;  %v524_v30 = vld [vmem:[%s3724_s1 + $0xd0] sm:$0xff]  ;;  %v525_v31 = vld [vmem:[%s3724_s1 + $0xd8] sm:$0xff]  ;;  %v526_v32 = vld [vmem:[%s3724_s1 + $0xe0] sm:$0xff] }
   0xc   :  { %v527_v33 = vld [vmem:[%s3724_s1 + $0xe8] sm:$0xff]  ;;  %v528_v34 = vld [vmem:[%s3724_s1 + $0xf0] sm:$0xff]  ;;  %v529_v35 = vld [vmem:[%s3724_s1 + $0xf8] sm:$0xff] }
   0xd   :  { %v530_v36 = vld [vmem:[%s3724_s1 + $0x100] sm:$0xff]  ;;  %v531_v37 = vld [vmem:[%s3724_s1 + $0x108] sm:$0xff]  ;;  %v532_v38 = vld [vmem:[%s3724_s1 + $0x110] sm:$0xff] }
   0xe   :  { %2305 = vmatmul.mubr.msk.f32.gmra.mxu0 %vm550_vm0, %v501_v7  ;;  %v533_v39 = vld [vmem:[%s3724_s1 + $0x118] sm:$0xff]  ;;  %v534_v40 = vld [vmem:[%s3724_s1 + $0x120] sm:$0xff]  ;;  %v535_v41 = vld [vmem:[%s3724_s1 + $0x128] sm:$0xff] }
   0xf   :  { %2307 = vmatprep.mubr.msk.f32.mxu0 %vm550_vm0, %v502_v8  ;;  %v536_v42 = vld [vmem:[%s3724_s1 + $0x130] sm:$0xff]  ;;  %v537_v43 = vld [vmem:[%s3724_s1 + $0x138] sm:$0xff]  ;;  %v538_v44 = vld [vmem:[%s3724_s1 + $0x140] sm:$0xff] }
  0x10   :  { %v539_v45 = vld [vmem:[%s3724_s1 + $0x148] sm:$0xff]  ;;  %v540_v46 = vld [vmem:[%s3724_s1 + $0x150] sm:$0xff]  ;;  %v541_v47 = vld [vmem:[%s3724_s1 + $0x158] sm:$0xff] }
  0x11   :  { %v542_v48 = vld [vmem:[%s3724_s1 + $0x160] sm:$0xff]  ;;  %v543_v49 = vld [vmem:[%s3724_s1 + $0x168] sm:$0xff]  ;;  %v544_v50 = vld [vmem:[%s3724_s1 + $0x170] sm:$0xff] }
  0x12   :  { %2308 = vmatmul.mubr.msk.f32.gmra.mxu0 %vm550_vm0, %v503_v9  ;;  %v545_v51 = vld [vmem:[%s3724_s1 + $0x178] sm:$0xff]  ;;  %v2884_v52 = vld [vmem:[%s3725_s0] sm:$0xff]   ;;  %v2892_v54 = vld [vmem:[%s3725_s0 + $0x8] sm:$0xff]  }
  0x13   :  { %2310 = vmatprep.mubr.msk.f32.mxu0 %vm550_vm0, %v504_v10  ;;  %v2028_v53 = vunpack.c.l.bf16 %v2884_v52  ;;  %v2032_v55 = vunpack.c.l.bf16 %v2892_v54  ;;  %v2029_v58 = vunpack.c.h.bf16 %v2884_v52  ;;  %v2033_v59 = vunpack.c.h.bf16 %v2892_v54  ;;  %v2904_v60 = vld [vmem:[%s3725_s0 + $0x10] sm:$0xff]   ;;  %v2917_v1 = vld [vmem:[%s3725_s0 + $0x18] sm:$0xff]   ;;  %v2930_v6 = vld [vmem:[%s3725_s0 + $0x20] sm:$0xff]  }
  0x14   :  { %v2036_v63 = vunpack.c.l.bf16 %v2904_v60  ;;  %v2037_v0 = vunpack.c.h.bf16 %v2904_v60  ;;  %v2040_v4 = vunpack.c.l.bf16 %v2917_v1  ;;  %v2041_v5 = vunpack.c.h.bf16 %v2917_v1 }
  0x15   :  { %2389 = vmatprep.mubr.msk.f32.mxu1 %vm113_vm1, %v2028_v53  ;;  %v120_v56 = vsel %vm113_vm1, %v2032_v55, 0.0  ;;  %v114_v57 = vsel %vm113_vm1, %v2028_v53, 0.0  ;;  %v123_v61 = vsel %vm113_vm1, %v2033_v59, 0.0  ;;  %v117_v62 = vsel %vm113_vm1, %v2029_v58, 0.0 }
  0x16   :  { %2311 = vmatmul.mubr.msk.f32.gmra.mxu0 %vm550_vm0, %v505_v11  ;;  %121 = vadd.xlane.f32.xlu1 %v120_v56  ;;  %v129_v2 = vsel %vm113_vm1, %v2037_v0, 0.0  ;;  %v126_v3 = vsel %vm113_vm1, %v2036_v63, 0.0  ;;  %v135_v7 = vsel %vm113_vm1, %v2041_v5, 0.0  ;;  %v132_v8 = vsel %vm113_vm1, %v2040_v4, 0.0  ;;  %v2943_v11 = vld [vmem:[%s3725_s0 + $0x28] sm:$0xff]  }
  0x17   :  { %2313 = vmatprep.mubr.msk.f32.mxu0 %vm550_vm0, %v506_v12  ;;  %115 = vadd.xlane.f32.xlu0 %v114_v57  ;;  %v2044_v9 = vunpack.c.l.bf16 %v2930_v6  ;;  %v2045_v10 = vunpack.c.h.bf16 %v2930_v6 }
  0x19   :  { %v141_v12 = vsel %vm113_vm1, %v2045_v10, 0.0 }
  0x1a   :  { %2314 = vmatmul.mubr.msk.f32.gmra.mxu0 %vm550_vm0, %v507_v13  ;;  %124 = vadd.xlane.f32.xlu1 %v123_v61  ;;  %v138_v13 = vsel %vm113_vm1, %v2044_v9, 0.0 }
  0x1b   :  { %2316 = vmatprep.mubr.msk.f32.mxu0 %vm550_vm0, %v508_v14  ;;  %118 = vadd.xlane.f32.xlu0 %v117_v62  ;;  %v2048_v14 = vunpack.c.l.bf16 %v2943_v11  ;;  %v3060_v62 = vld [vmem:[%s3725_s0 + $0x70] sm:$0xff]  }
  0x1e   :  { %2317 = vmatmul.mubr.msk.f32.gmra.mxu0 %vm550_vm0, %v509_v15  ;;  %130 = vadd.xlane.f32.xlu1 %v129_v2  ;;  %v2049_v15 = vunpack.c.h.bf16 %v2943_v11 }
  0x1f   :  { %2319 = vmatprep.mubr.msk.f32.mxu0 %vm550_vm0, %v510_v16  ;;  %127 = vadd.xlane.f32.xlu0 %v126_v3  ;;  %v2956_v16 = vld [vmem:[%s3725_s0 + $0x30] sm:$0xff]  }
  0x22   :  { %2320 = vmatmul.mubr.msk.f32.gmra.mxu0 %vm550_vm0, %v511_v17  ;;  %136 = vadd.xlane.f32.xlu1 %v135_v7  ;;  %v147_v17 = vsel %vm113_vm1, %v2049_v15, 0.0  ;;  %v3738_v7 = vunpack.c.l.bf16 %v3060_v62 }
  0x23   :  { %2322 = vmatprep.mubr.msk.f32.mxu0 %vm550_vm0, %v512_v18  ;;  %133 = vadd.xlane.f32.xlu0 %v132_v8  ;;  %v144_v18 = vsel %vm113_vm1, %v2048_v14, 0.0  ;;  %v3735_v8 = vunpack.c.h.bf16 %v3060_v62 }
  0x26   :  { %2323 = vmatmul.mubr.msk.f32.gmra.mxu0 %vm550_vm0, %v513_v19  ;;  %142 = vadd.xlane.f32.xlu1 %v141_v12  ;;  %v2052_v19 = vunpack.c.l.bf16 %v2956_v16  ;;  %v3073_v12 = vld [vmem:[%s3725_s0 + $0x78] sm:$0xff]  }
  0x27   :  { %2325 = vmatprep.mubr.msk.f32.mxu0 %vm550_vm0, %v514_v20  ;;  %139 = vadd.xlane.f32.xlu0 %v138_v13  ;;  %v2053_v20 = vunpack.c.h.bf16 %v2956_v16  ;;  %v3078_v13 = vld [vmem:[%s3725_s0 + $0xa0] sm:$0xff]  }
  0x2a   :  { %2326 = vmatmul.mubr.msk.f32.gmra.mxu0 %vm550_vm0, %v515_v21  ;;  %148 = vadd.xlane.f32.xlu1 %v147_v17  ;;  %v153_v21 = vsel %vm113_vm1, %v2053_v20, 0.0  ;;  %v201_v17 = vsel %vm113_vm1, %v3735_v8, 0.0  ;;  %v3741_v8 = vunpack.c.h.bf16 %v3078_v13 }
  0x2b   :  { %2328 = vmatprep.mubr.msk.f32.mxu0 %vm550_vm0, %v516_v22  ;;  %145 = vadd.xlane.f32.xlu0 %v144_v18  ;;  %v150_v22 = vsel %vm113_vm1, %v2052_v19, 0.0  ;;  %v198_v18 = vsel %vm113_vm1, %v3738_v7, 0.0 }
  0x2e   :  { %2329 = vmatmul.mubr.msk.f32.gmra.mxu0 %vm550_vm0, %v517_v23  ;;  %154 = vadd.xlane.f32.xlu1 %v153_v21  ;;  %v2975_v23 = vld [vmem:[%s3725_s0 + $0x38] sm:$0xff]   ;;  %v2108_v21 = vunpack.c.l.bf16 %v3078_v13 }
  0x2f   :  { %2331 = vmatprep.mubr.msk.f32.mxu0 %vm550_vm0, %v518_v24  ;;  %151 = vadd.xlane.f32.xlu0 %v150_v22  ;;  %v2056_v24 = vunpack.c.l.bf16 %v2975_v23  ;;  %v3733_v22 = vunpack.c.l.bf16 %v3073_v12 }
  0x32   :  { %2332 = vmatmul.mubr.msk.f32.gmra.mxu0 %vm550_vm0, %v519_v25  ;;  %v2057_v25 = vunpack.c.h.bf16 %v2975_v23 }
  0x33   :  { %2334 = vmatprep.mubr.msk.f32.mxu0 %vm550_vm0, %v520_v26  ;;  %v2982_v26 = vld [vmem:[%s3725_s0 + $0x40] sm:$0xff]  }
  0x36   :  { %2335 = vmatmul.mubr.msk.f32.gmra.mxu0 %vm550_vm0, %v521_v27  ;;  %v159_v27 = vsel %vm113_vm1, %v2057_v25, 0.0 }
  0x37   :  { %2337 = vmatprep.mubr.msk.f32.mxu0 %vm550_vm0, %v522_v28  ;;  %v156_v28 = vsel %vm113_vm1, %v2056_v24, 0.0  ;;  %160 = vadd.xlane.f32.xlu1 %v159_v27  ;;  %v3731_v27 = vunpack.c.h.bf16 %v3073_v12 }
  0x38   :  { %157 = vadd.xlane.f32.xlu0 %v156_v28  ;;  %v3092_v28 = vld [vmem:[%s3725_s0 + $0x80] sm:$0xff]  }
  0x3a   :  { %2338 = vmatmul.mubr.msk.f32.gmra.mxu0 %vm550_vm0, %v523_v29  ;;  %v2060_v29 = vunpack.c.l.bf16 %v2982_v26 }
  0x3b   :  { %2340 = vmatprep.mubr.msk.f32.mxu0 %vm550_vm0, %v524_v30  ;;  %v2061_v30 = vunpack.c.h.bf16 %v2982_v26 }
  0x3e   :  { %2341 = vmatmul.mubr.msk.f32.gmra.mxu0 %vm550_vm0, %v525_v31  ;;  %v2995_v31 = vld [vmem:[%s3725_s0 + $0x48] sm:$0xff]  }
  0x3f   :  { %2343 = vmatprep.mubr.msk.f32.mxu0 %vm550_vm0, %v526_v32  ;;  %v165_v32 = vsel %vm113_vm1, %v2061_v30, 0.0 }
  0x40   :  { %166 = vadd.xlane.f32.xlu1 %v165_v32  ;;  %v207_v32 = vsel %vm113_vm1, %v3731_v27, 0.0 }
  0x42   :  { %2344 = vmatmul.mubr.msk.f32.gmra.mxu0 %vm550_vm0, %v527_v33  ;;  %v162_v33 = vsel %vm113_vm1, %v2060_v29, 0.0 }
  0x43   :  { %2346 = vmatprep.mubr.msk.f32.mxu0 %vm550_vm0, %v528_v34  ;;  %163 = vadd.xlane.f32.xlu0 %v162_v33  ;;  %v2064_v34 = vunpack.c.l.bf16 %v2995_v31  ;;  %v204_v33 = vsel %vm113_vm1, %v3733_v22, 0.0 }
  0x46   :  { %2347 = vmatmul.mubr.msk.f32.gmra.mxu0 %vm550_vm0, %v529_v35  ;;  %v2065_v35 = vunpack.c.h.bf16 %v2995_v31 }
  0x47   :  { %2349 = vmatprep.mubr.msk.f32.mxu0 %vm550_vm0, %v530_v36  ;;  %v3008_v36 = vld [vmem:[%s3725_s0 + $0x50] sm:$0xff]  }
  0x4a   :  { %2350 = vmatmul.mubr.msk.f32.gmra.mxu0 %vm550_vm0, %v531_v37  ;;  %v171_v37 = vsel %vm113_vm1, %v2065_v35, 0.0 }
  0x4b   :  { %2352 = vmatprep.mubr.msk.f32.mxu0 %vm550_vm0, %v532_v38  ;;  %v168_v38 = vsel %vm113_vm1, %v2064_v34, 0.0  ;;  %172 = vadd.xlane.f32.xlu1 %v171_v37  ;;  %v3730_v37 = vunpack.c.l.bf16 %v3092_v28 }
  0x4c   :  { %169 = vadd.xlane.f32.xlu0 %v168_v38  ;;  %v3728_v38 = vunpack.c.h.bf16 %v3092_v28 }
  0x4e   :  { %2353 = vmatmul.mubr.msk.f32.gmra.mxu0 %vm550_vm0, %v533_v39  ;;  %v2068_v39 = vunpack.c.l.bf16 %v3008_v36 }
  0x4f   :  { %2355 = vmatprep.mubr.msk.f32.mxu0 %vm550_vm0, %v534_v40  ;;  %v2069_v40 = vunpack.c.h.bf16 %v3008_v36 }
  0x52   :  { %2356 = vmatmul.mubr.msk.f32.gmra.mxu0 %vm550_vm0, %v535_v41  ;;  %v3021_v41 = vld [vmem:[%s3725_s0 + $0x58] sm:$0xff]  }
  0x53   :  { %2358 = vmatprep.mubr.msk.f32.mxu0 %vm550_vm0, %v536_v42  ;;  %v177_v42 = vsel %vm113_vm1, %v2069_v40, 0.0 }
  0x54   :  { %178 = vadd.xlane.f32.xlu1 %v177_v42  ;;  %v3106_v42 = vld [vmem:[%s3725_s0 + $0x88] sm:$0xff]  }
  0x56   :  { %2359 = vmatmul.mubr.msk.f32.gmra.mxu0 %vm550_vm0, %v537_v43  ;;  %v174_v43 = vsel %vm113_vm1, %v2068_v39, 0.0 }
  0x57   :  { %2361 = vmatprep.mubr.msk.f32.mxu0 %vm550_vm0, %v538_v44  ;;  %175 = vadd.xlane.f32.xlu0 %v174_v43  ;;  %v2072_v44 = vunpack.c.l.bf16 %v3021_v41  ;;  %v213_v43 = vsel %vm113_vm1, %v3728_v38, 0.0 }
  0x5a   :  { %2362 = vmatmul.mubr.msk.f32.gmra.mxu0 %vm550_vm0, %v539_v45  ;;  %v2073_v45 = vunpack.c.h.bf16 %v3021_v41  ;;  %v3753_v41 = vunpack.c.l.bf16 %v3073_v12 }
  0x5b   :  { %2364 = vmatprep.mubr.msk.f32.mxu0 %vm550_vm0, %v540_v46  ;;  %v3034_v46 = vld [vmem:[%s3725_s0 + $0x60] sm:$0xff]  }
  0x5c   :  { %v3747_v23 = vunpack.c.l.bf16 %v3034_v46 }
  0x5e   :  { %2365 = vmatmul.mubr.msk.f32.gmra.mxu0 %vm550_vm0, %v541_v47  ;;  %v183_v47 = vsel %vm113_vm1, %v2073_v45, 0.0 }
  0x5f   :  { %2367 = vmatprep.mubr.msk.f32.mxu0 %vm550_vm0, %v542_v48  ;;  %v180_v48 = vsel %vm113_vm1, %v2072_v44, 0.0  ;;  %184 = vadd.xlane.f32.xlu1 %v183_v47  ;;  %v210_v47 = vsel %vm113_vm1, %v3730_v37, 0.0 }
  0x60   :  { %181 = vadd.xlane.f32.xlu0 %v180_v48  ;;  %v3117_v48 = vld [vmem:[%s3725_s0 + $0x90] sm:$0xff]  }
  0x62   :  { %2368 = vmatmul.mubr.msk.f32.gmra.mxu0 %vm550_vm0, %v543_v49  ;;  %v3746_v49 = vunpack.c.l.bf16 %v3034_v46 }
  0x63   :  { %2370 = vmatprep.mubr.msk.f32.mxu0 %vm550_vm0, %v544_v50  ;;  %v3745_v50 = vunpack.c.h.bf16 %v3034_v46 }
  0x64   :  { %v186_v56 = vsel %vm113_vm1, %v3746_v49, 0.0 }
  0x65   :  { %v189_v53 = vsel %vm113_vm1, %v3745_v50, 0.0  ;;  %187 = vadd.xlane.f32.xlu0 %v186_v56  ;;  %v3732_v56 = vunpack.c.l.bf16 %v3106_v42 }
  0x66   :  { %2371 = vmatmul.mubr.msk.f32.gmra.mxu0 %vm550_vm0, %v545_v51  ;;  %v3047_v51 = vld [vmem:[%s3725_s0 + $0x68] sm:$0xff]   ;;  %190 = vadd.xlane.f32.xlu1 %v189_v53 }
  0x67   :  { %v3742_v57 = vunpack.c.l.bf16 %v3047_v51  ;;  %v3740_v61 = vunpack.c.h.bf16 %v3047_v51  ;;  %2529 = vmatprep.mubr.msk.f32.mxu0 %vm113_vm1, %v2108_v21  ;;  %v3750_v31 = vunpack.c.h.bf16 %v3047_v51 }
  0x69   :  { %v195_v2 = vsel %vm113_vm1, %v3740_v61, 0.0  ;;  %v192_v3 = vsel %vm113_vm1, %v3742_v57, 0.0 }
  0x6a   :  { %196 = vadd.xlane.f32.xlu1 %v195_v2  ;;  %193 = vadd.xlane.f32.xlu0 %v192_v3  ;;  %v3729_v2 = vunpack.c.h.bf16 %v3106_v42 }
  0x6e   :  { %202 = vadd.xlane.f32.xlu1 %v201_v17  ;;  %199 = vadd.xlane.f32.xlu0 %v198_v18  ;;  %v3736_v17 = vunpack.c.l.bf16 %v3117_v48  ;;  %v3734_v18 = vunpack.c.h.bf16 %v3117_v48 }
  0x70   :  { %v225_v38 = vsel %vm113_vm1, %v3734_v18, 0.0 }
  0x72   :  { %208 = vadd.xlane.f32.xlu1 %v207_v32  ;;  %205 = vadd.xlane.f32.xlu0 %v204_v33  ;;  %v219_v32 = vsel %vm113_vm1, %v3729_v2, 0.0  ;;  %v216_v33 = vsel %vm113_vm1, %v3732_v56, 0.0  ;;  %v222_v2 = vsel %vm113_vm1, %v3736_v17, 0.0  ;;  %v3156_v17 = vld [vmem:[%s3725_s0 + $0xa8] sm:$0xff]  }
  0x73   :  { %v3744_v61 = vunpack.c.l.bf16 %v3156_v17 }
  0x76   :  { %214 = vadd.xlane.f32.xlu1 %v213_v43  ;;  %211 = vadd.xlane.f32.xlu0 %v210_v47  ;;  %v3136_v43 = vld [vmem:[%s3725_s0 + $0x98] sm:$0xff]  }
  0x77   :  { %v3739_v27 = vunpack.c.l.bf16 %v3136_v43  ;;  %v3737_v56 = vunpack.c.h.bf16 %v3136_v43 }
  0x7a   :  { %220 = vadd.xlane.f32.xlu1 %v219_v32  ;;  %217 = vadd.xlane.f32.xlu0 %v216_v33  ;;  %v231_v32 = vsel %vm113_vm1, %v3737_v56, 0.0  ;;  %v228_v33 = vsel %vm113_vm1, %v3739_v27, 0.0  ;;  %v234_v56 = vsel %vm113_vm1, %v2108_v21, 0.0  ;;  %v3743_v27 = vunpack.c.h.bf16 %v3156_v17 }
  0x7c   :  { %v243_v21 = vsel %vm113_vm1, %v3743_v27, 0.0 }
  0x7e   :  { %226 = vadd.xlane.f32.xlu1 %v225_v38  ;;  %223 = vadd.xlane.f32.xlu0 %v222_v2  ;;  %v237_v2 = vsel %vm113_vm1, %v3741_v8, 0.0 }
  0x82   :  { %232 = vadd.xlane.f32.xlu1 %v231_v32  ;;  %229 = vadd.xlane.f32.xlu0 %v228_v33  ;;  %v3167_v32 = vld [vmem:[%s3725_s0 + $0xb0] sm:$0xff]  }
  0x83   :  { %v2117_v57 = vunpack.c.h.bf16 %v3167_v32 }
  0x85   :  { %v249_v27 = vsel %vm113_vm1, %v2117_v57, 0.0 }
  0x86   :  { %238 = vadd.xlane.f32.xlu1 %v237_v2  ;;  %235 = vadd.xlane.f32.xlu0 %v234_v56  ;;  %v2116_v2 = vunpack.c.l.bf16 %v3167_v32 }
  0x8a   :  { %244 = vadd.xlane.f32.xlu1 %v243_v21 }
  0x8e   :  { %250 = vadd.xlane.f32.xlu1 %v249_v27 }
  0xca   :  { %v3119_v53 = vpop.f32.mrf.mxu0 }
  0xcc   :  { %v3123_v3 = vpop.f32.mrf.mxu0 }
  0xce   :  { %v2306_v47 = vpop.f32.mrf.mxu0 }
  0xd0   :  { %v771_v37 = vpop.f32.mrf.mxu0 }
  0xd2   :  { %v2309_v22 = vpop.f32.mrf.mxu0 }
  0xd4   :  { %v781_v18 = vpop.f32.mrf.mxu0 }
  0xd6   :  { %v2312_v38 = vpop.f32.mrf.mxu0 }
  0xd7   :  { %2373 = vmatprep.subr.mxu1 %v2312_v38 }
  0xd8   :  { %v791_v7 = vpop.f32.mrf.mxu0  ;;  %2374 = vmatpush3.msra.mxu1 %v2312_v38  ;;  %v240_v38 = vsel %vm113_vm1, %v3744_v61, 0.0 }
  0xd9   :  { %2375 = vmatprep.subr.mxu1 %v791_v7  ;;  %241 = vadd.xlane.f32.xlu0 %v240_v38 }
  0xda   :  { %v3169_v33 = vpop.f32.mrf.mxu0  ;;  %2376 = vmatpush3.msra.mxu1 %v791_v7  ;;  %v3182_v7 = vld [vmem:[%s3725_s0 + $0xb8] sm:$0xff]  }
  0xdb   :  { %2377 = vmatprep.subr.mxu1 %v2309_v22  ;;  %v2121_v50 = vunpack.c.h.bf16 %v3182_v7  ;;  %v2120_v49 = vunpack.c.l.bf16 %v3182_v7 }
  0xdc   :  { %v801_v8 = vpop.f32.mrf.mxu0  ;;  %2378 = vmatpush3.msra.mxu1 %v2309_v22  ;;  %v246_v22 = vsel %vm113_vm1, %v2116_v2, 0.0 }
  0xdd   :  { %2379 = vmatprep.subr.mxu1 %v781_v18  ;;  %247 = vadd.xlane.f32.xlu0 %v246_v22  ;;  %v252_v38 = vsel %vm113_vm1, %v2120_v49, 0.0  ;;  %v3761_v22 = vunpack.c.h.bf16 %v3117_v48 }
  0xde   :  { %v2318_v56 = vpop.f32.mrf.mxu0  ;;  %2380 = vmatpush3.msra.mxu1 %v781_v18  ;;  %v255_v18 = vsel %vm113_vm1, %v2121_v50, 0.0 }
  0xdf   :  { %2381 = vmatprep.subr.mxu1 %v2306_v47  ;;  %256 = vadd.xlane.f32.xlu1 %v255_v18  ;;  %v3765_v18 = vunpack.c.h.bf16 %v3156_v17 }
  0xe0   :  { %v811_v61 = vpop.f32.mrf.mxu0  ;;  %2382 = vmatpush3.msra.mxu1 %v2306_v47 }
  0xe1   :  { %2383 = vmatprep.subr.mxu1 %v771_v37  ;;  %253 = vadd.xlane.f32.xlu0 %v252_v38 }
  0xe2   :  { %v2321_v21 = vpop.f32.mrf.mxu0  ;;  %2384 = vmatpush3.msra.mxu1 %v771_v37 }
  0xe3   :  { %2385 = vmatprep.subr.mxu1 %v3119_v53 }
  0xe4   :  { %v821_v47 = vpop.f32.mrf.mxu0  ;;  %2386 = vmatpush3.msra.mxu1 %v3119_v53 }
  0xe5   :  { %2387 = vmatprep.subr.mxu1 %v3123_v3 }
  0xe6   :  { %v2324_v27 = vpop.f32.mrf.mxu0  ;;  %2388 = vmatpush3.msra.mxu1 %v3123_v3 }
  0xe7   :  { %2401 = vmatprep.subr.mxu1 %v2324_v27  ;;  %2390 = vmatmul.mubr.msk.f32.vlgmr.msra.gmra.mxu1 %vm113_vm1, %v2029_v58 }
  0xe8   :  { %v831_v37 = vpop.f32.mrf.mxu0  ;;  %2402 = vmatpush3.msra.mxu1 %v2324_v27  ;;  %2392 = vmatprep.mubr.msk.f32.mxu1 %vm113_vm1, %v2032_v55 }
  0xe9   :  { %2403 = vmatprep.subr.mxu1 %v831_v37 }
  0xea   :  { %v2327_v53 = vpop.f32.mrf.mxu0  ;;  %2404 = vmatpush3.msra.mxu1 %v831_v37 }
  0xeb   :  { %2405 = vmatprep.subr.mxu1 %v2321_v21  ;;  %2393 = vmatmul.mubr.msk.f32.gmra.mxu1 %vm113_vm1, %v2033_v59 }
  0xec   :  { %v841_v3 = vpop.f32.mrf.mxu0  ;;  %2406 = vmatpush3.msra.mxu1 %v2321_v21  ;;  %2395 = vmatprep.mubr.msk.f32.mxu1 %vm113_vm1, %v2036_v63  ;;  %v3762_v21 = vunpack.c.l.bf16 %v3136_v43 }
  0xed   :  { %2407 = vmatprep.subr.mxu1 %v821_v47 }
  0xee   :  { %v2330_v52 = vpop.f32.mrf.mxu0  ;;  %2408 = vmatpush3.msra.mxu1 %v821_v47 }
  0xef   :  { %2409 = vmatprep.subr.mxu1 %v2318_v56  ;;  %2396 = vmatmul.mubr.msk.f32.gmra.mxu1 %vm113_vm1, %v2037_v0 }
  0xf0   :  { %v851_v55 = vpop.f32.mrf.mxu0  ;;  %2410 = vmatpush3.msra.mxu1 %v2318_v56  ;;  %2398 = vmatprep.mubr.msk.f32.mxu1 %vm113_vm1, %v2040_v4  ;;  %v3760_v56 = vunpack.c.l.bf16 %v3117_v48  ;;  %v3342_v48 = vpop.xlane.xlu1 %121 }
  0xf1   :  { %2411 = vmatprep.subr.mxu1 %v811_v61  ;;  %vm260_vm5 = vcmp.gt.f32.partialorder %v3342_v48, 0.0 }
  0xf2   :  { %v2333_v54 = vpop.f32.mrf.mxu0  ;;  %2412 = vmatpush3.msra.mxu1 %v811_v61 }
  0xf3   :  { %2413 = vmatprep.subr.mxu1 %v3169_v33  ;;  %2399 = vmatmul.mubr.msk.f32.gmra.mxu1 %vm113_vm1, %v2041_v5 }
  0xf4   :  { %v861_v58 = vpop.f32.mrf.mxu0  ;;  %2414 = vmatpush3.msra.mxu1 %v3169_v33  ;;  %2417 = vmatprep.mubr.msk.f32.mxu1 %vm113_vm1, %v2044_v9  ;;  %v3759_v33 = vunpack.c.h.bf16 %v3078_v13  ;;  %v3764_v13 = vunpack.c.l.bf16 %v3156_v17  ;;  %v116_v17 = vpop.xlane.xlu0 %115 }
  0xf5   :  { %2415 = vmatprep.subr.mxu1 %v801_v8  ;;  %vm258_vm3 = vcmp.gt.f32.partialorder %v116_v17, 0.0 }
  0xf6   :  { %v2336_v59 = vpop.f32.mrf.mxu0  ;;  %2416 = vmatpush3.msra.mxu1 %v801_v8  ;;  %v3756_v8 = vunpack.c.h.bf16 %v3092_v28 }
  0xf7   :  { %2429 = vmatprep.subr.mxu1 %v2336_v59  ;;  %2418 = vmatmul.mubr.msk.f32.vlgmr.msra.gmra.mxu1 %vm113_vm1, %v2045_v10 }
  0xf8   :  { %v871_v60 = vpop.f32.mrf.mxu0  ;;  %2430 = vmatpush3.msra.mxu1 %v2336_v59  ;;  %2420 = vmatprep.mubr.msk.f32.mxu1 %vm113_vm1, %v2048_v14  ;;  %v119_v38 = vpop.xlane.xlu0 %118  ;;  %v308_v59 = vmax.f32 %v3342_v48, 1.0 }
  0xf9   :  { %2431 = vmatprep.subr.mxu1 %v871_v60  ;;  %vm259_vm2 = vcmp.gt.f32.partialorder %v119_v38, 0.0 }
  0xfa   :  { %v2339_v63 = vpop.f32.mrf.mxu0  ;;  %2432 = vmatpush3.msra.mxu1 %v871_v60 }
  0xfb   :  { %2433 = vmatprep.subr.mxu1 %v2333_v54  ;;  %2421 = vmatmul.mubr.msk.f32.gmra.mxu1 %vm113_vm1, %v2049_v15 }
  0xfc   :  { %v881_v0 = vpop.f32.mrf.mxu0  ;;  %2434 = vmatpush3.msra.mxu1 %v2333_v54  ;;  %2423 = vmatprep.mubr.msk.f32.mxu1 %vm113_vm1, %v2052_v19 }
  0xfd   :  { %2435 = vmatprep.subr.mxu1 %v861_v58 }
  0xfe   :  { %v2342_v1 = vpop.f32.mrf.mxu0  ;;  %2436 = vmatpush3.msra.mxu1 %v861_v58 }
  0xff   :  { %2437 = vmatprep.subr.mxu1 %v2330_v52  ;;  %2424 = vmatmul.mubr.msk.f32.gmra.mxu1 %vm113_vm1, %v2053_v20 }
 0x100   :  { %v891_v4 = vpop.f32.mrf.mxu0  ;;  %2438 = vmatpush3.msra.mxu1 %v2330_v52  ;;  %2426 = vmatprep.mubr.msk.f32.mxu1 %vm113_vm1, %v2056_v24 }
 0x101   :  { %2439 = vmatprep.subr.mxu1 %v851_v55 }
 0x102   :  { %v2345_v5 = vpop.f32.mrf.mxu0  ;;  %2440 = vmatpush3.msra.mxu1 %v851_v55  ;;  %v306_v55 = vmax.f32 %v116_v17, 1.0 }
 0x103   :  { %2441 = vmatprep.subr.mxu1 %v2327_v53  ;;  %2427 = vmatmul.mubr.msk.f32.gmra.mxu1 %vm113_vm1, %v2057_v25  ;;  %v3748_v25 = vunpack.c.h.bf16 %v3034_v46 }
 0x104   :  { %v901_v6 = vpop.f32.mrf.mxu0  ;;  %2442 = vmatpush3.msra.mxu1 %v2327_v53  ;;  %2445 = vmatprep.mubr.msk.f32.mxu1 %vm113_vm1, %v2060_v29  ;;  %v3749_v29 = vunpack.c.l.bf16 %v3047_v51  ;;  %v3755_v51 = vunpack.c.l.bf16 %v3092_v28  ;;  %v3758_v28 = vunpack.c.h.bf16 %v3106_v42 }
 0x105   :  { %2443 = vmatprep.subr.mxu1 %v841_v3 }
 0x106   :  { %v2348_v9 = vpop.f32.mrf.mxu0  ;;  %2444 = vmatpush3.msra.mxu1 %v841_v3  ;;  %v307_v3 = vmax.f32 %v119_v38, 1.0 }
 0x107   :  { %2457 = vmatprep.subr.mxu1 %v2348_v9  ;;  %2446 = vmatmul.mubr.msk.f32.vlgmr.msra.gmra.mxu1 %vm113_vm1, %v2061_v30 }
 0x108   :  { %v911_v10 = vpop.f32.mrf.mxu0  ;;  %2458 = vmatpush3.msra.mxu1 %v2348_v9  ;;  %2448 = vmatprep.mubr.msk.f32.mxu1 %vm113_vm1, %v2064_v34  ;;  %2557 = vrcp.f32 %v307_v3 }
 0x109   :  { %2459 = vmatprep.subr.mxu1 %v911_v10  ;;  %2559 = vrcp.f32 %v306_v55 }
 0x10a   :  { %v2351_v11 = vpop.f32.mrf.mxu0  ;;  %2460 = vmatpush3.msra.mxu1 %v911_v10 }
 0x10b   :  { %2461 = vmatprep.subr.mxu1 %v2345_v5  ;;  %2449 = vmatmul.mubr.msk.f32.gmra.mxu1 %vm113_vm1, %v2065_v35  ;;  %v3751_v35 = vunpack.c.l.bf16 %v3060_v62 }
 0x10c   :  { %v921_v14 = vpop.f32.mrf.mxu0  ;;  %2462 = vmatpush3.msra.mxu1 %v2345_v5  ;;  %2451 = vmatprep.mubr.msk.f32.mxu1 %vm113_vm1, %v2068_v39  ;;  %v3752_v39 = vunpack.c.h.bf16 %v3060_v62 }
 0x10d   :  { %2463 = vmatprep.subr.mxu1 %v901_v6 }
 0x10e   :  { %v2354_v15 = vpop.f32.mrf.mxu0  ;;  %2464 = vmatpush3.msra.mxu1 %v901_v6 }
 0x10f   :  { %2465 = vmatprep.subr.mxu1 %v2342_v1  ;;  %2452 = vmatmul.mubr.msk.f32.gmra.mxu1 %vm113_vm1, %v2069_v40 }
 0x110   :  { %v931_v16 = vpop.f32.mrf.mxu0  ;;  %2466 = vmatpush3.msra.mxu1 %v2342_v1  ;;  %2454 = vmatprep.mubr.msk.f32.mxu1 %vm113_vm1, %v2072_v44 }
 0x111   :  { %2467 = vmatprep.subr.mxu1 %v891_v4 }
 0x112   :  { %v2357_v19 = vpop.f32.mrf.mxu0  ;;  %2468 = vmatpush3.msra.mxu1 %v891_v4 }
 0x113   :  { %2469 = vmatprep.subr.mxu1 %v2339_v63  ;;  %2455 = vmatmul.mubr.msk.f32.gmra.mxu1 %vm113_vm1, %v2073_v45  ;;  %v3754_v45 = vunpack.c.h.bf16 %v3073_v12  ;;  %v3757_v12 = vunpack.c.l.bf16 %v3106_v42  ;;  %v3763_v42 = vunpack.c.h.bf16 %v3136_v43  ;;  %v125_v43 = vpop.xlane.xlu1 %124 }
 0x114   :  { %v941_v20 = vpop.f32.mrf.mxu0  ;;  %2470 = vmatpush3.msra.mxu1 %v2339_v63  ;;  %2473 = vmatprep.mubr.msk.f32.mxu1 %vm113_vm1, %v3747_v23  ;;  %v309_v58 = vmax.f32 %v125_v43, 1.0  ;;  %v3388_v23 = vld [vmem:[%s3726_s3] ss:$0 sm:$0xff]  ;;  %vm261_vm4 = vcmp.gt.f32.partialorder %v125_v43, 0.0 }
 0x115   :  { %2471 = vmatprep.subr.mxu1 %v881_v0 }
 0x116   :  { %v2360_v24 = vpop.f32.mrf.mxu0  ;;  %2472 = vmatpush3.msra.mxu1 %v881_v0  ;;  %2561 = vrcp.f32 %v309_v58 }
 0x117   :  { %2485 = vmatprep.subr.mxu1 %v2360_v24  ;;  %2474 = vmatmul.mubr.msk.f32.vlgmr.msra.gmra.mxu1 %vm113_vm1, %v3748_v25  ;;  %v3344_v47 = vpop.xlane.xlu1 %130  ;;  %2563 = vrcp.f32 %v308_v59 }
 0x118   :  { %v951_v26 = vpop.f32.mrf.mxu0  ;;  %2486 = vmatpush3.msra.mxu1 %v2360_v24  ;;  %2476 = vmatprep.mubr.msk.f32.mxu1 %vm113_vm1, %v3749_v29  ;;  %v311_v63 = vmax.f32 %v3344_v47, 1.0  ;;  %vm263_vm6 = vcmp.gt.f32.partialorder %v3344_v47, 0.0 }
 0x119   :  { %2487 = vmatprep.subr.mxu1 %v951_v26 }
 0x11a   :  { %v2363_v30 = vpop.f32.mrf.mxu0  ;;  %2488 = vmatpush3.msra.mxu1 %v951_v26  ;;  %2565 = vrcp.f32 %v311_v63 }
 0x11b   :  { %2489 = vmatprep.subr.mxu1 %v2357_v19  ;;  %2477 = vmatmul.mubr.msk.f32.gmra.mxu1 %vm113_vm1, %v3750_v31  ;;  %v3348_v32 = vpop.xlane.xlu1 %136 }
 0x11c   :  { %v961_v34 = vpop.f32.mrf.mxu0  ;;  %2490 = vmatpush3.msra.mxu1 %v2357_v19  ;;  %2479 = vmatprep.mubr.msk.f32.mxu1 %vm113_vm1, %v3751_v35  ;;  %v313_v4 = vmax.f32 %v3348_v32, 1.0  ;;  %vm265_vm8 = vcmp.gt.f32.partialorder %v3348_v32, 0.0 }
 0x11d   :  { %2491 = vmatprep.subr.mxu1 %v941_v20 }
 0x11e   :  { %v2366_v36 = vpop.f32.mrf.mxu0  ;;  %2492 = vmatpush3.msra.mxu1 %v941_v20 }
 0x11f   :  { %2493 = vmatprep.subr.mxu1 %v2354_v15  ;;  %2480 = vmatmul.mubr.msk.f32.gmra.mxu1 %vm113_vm1, %v3752_v39  ;;  %v3352_v27 = vpop.xlane.xlu1 %142 }
 0x120   :  { %v971_v40 = vpop.f32.mrf.mxu0  ;;  %2494 = vmatpush3.msra.mxu1 %v2354_v15  ;;  %2482 = vmatprep.mubr.msk.f32.mxu1 %vm113_vm1, %v3753_v41  ;;  %v315_v10 = vmax.f32 %v3352_v27, 1.0  ;;  %vm267_vm10 = vcmp.gt.f32.partialorder %v3352_v27, 0.0 }
 0x121   :  { %2495 = vmatprep.subr.mxu1 %v931_v16 }
 0x122   :  { %v2369_v44 = vpop.f32.mrf.mxu0  ;;  %2496 = vmatpush3.msra.mxu1 %v931_v16 }
 0x123   :  { %2497 = vmatprep.subr.mxu1 %v2351_v11  ;;  %2483 = vmatmul.mubr.msk.f32.gmra.mxu1 %vm113_vm1, %v3754_v45  ;;  %v3356_v7 = vpop.xlane.xlu1 %148 }
 0x124   :  { %v981_v46 = vpop.f32.mrf.mxu0  ;;  %2498 = vmatpush3.msra.mxu1 %v2351_v11  ;;  %2501 = vmatprep.mubr.msk.f32.mxu1 %vm113_vm1, %v3755_v51  ;;  %v2558_v11 = vpop.eup %2557  ;;  %v317_v24 = vmax.f32 %v3356_v7, 1.0  ;;  %vm269_vm12 = vcmp.gt.f32.partialorder %v3356_v7, 0.0 }
 0x125   :  { %2499 = vmatprep.subr.mxu1 %v921_v14  ;;  %v2560_v16 = vpop.eup %2559  ;;  %v451_v19 = vsel %vm259_vm2, %v2558_v11, 0.0 }
 0x126   :  { %v2372_v61 = vpop.f32.mrf.mxu0  ;;  %2500 = vmatpush3.msra.mxu1 %v921_v14  ;;  %v2562_v26 = vpop.eup %2561 }
 0x127   :  { %2513 = vmatprep.subr.mxu0 %v2372_v61  ;;  %2541 = vmatprep.subr.mxu1 %v2372_v61  ;;  %v3360_v37 = vpop.xlane.xlu1 %154  ;;  %v2564_v35 = vpop.eup %2563 }
 0x128   :  { %v991_v62 = vpop.f32.mrf.mxu0  ;;  %2502 = vmatmul.mubr.msk.f32.vlgmr.msra.gmra.mxu1 %vm113_vm1, %v3756_v8  ;;  %2514 = vmatpush3.msra.mxu0 %v2372_v61  ;;  %vm271_vm14 = vcmp.gt.f32.partialorder %v3360_v37, 0.0 }
 0x129   :  { %2549 = vmatpush3.msra.mxu1 %v2372_v61  ;;  %2515 = vmatprep.subr.mxu0 %v991_v62 }
 0x12a   :  { %2542 = vmatprep.subr.mxu1 %v991_v62  ;;  %2516 = vmatpush3.msra.mxu0 %v991_v62 }
 0x12b   :  { %2550 = vmatpush3.msra.mxu1 %v991_v62  ;;  %2517 = vmatprep.subr.mxu0 %v2369_v44  ;;  %v3364_v52 = vpop.xlane.xlu1 %160  ;;  %v452_v62 = vsel %vm260_vm5, %v2564_v35, 0.0 }
 0x12c   :  { %2543 = vmatprep.subr.mxu1 %v2369_v44  ;;  %2518 = vmatpush3.msra.mxu0 %v2369_v44  ;;  %vm273_vm0 = vcmp.gt.f32.partialorder %v3364_v52, 0.0 }
 0x12d   :  { %2551 = vmatpush3.msra.mxu1 %v2369_v44  ;;  %2519 = vmatprep.subr.mxu0 %v981_v46  ;;  %v319_v44 = vmax.f32 %v3360_v37, 1.0 }
 0x12e   :  { %2544 = vmatprep.subr.mxu1 %v981_v46  ;;  %2520 = vmatpush3.msra.mxu0 %v981_v46 }
 0x12f   :  { %2552 = vmatpush3.msra.mxu1 %v981_v46  ;;  %2521 = vmatprep.subr.mxu0 %v2366_v36  ;;  %v3369_v60 = vpop.xlane.xlu1 %166  ;;  %v2566_v46 = vpop.eup %2565 }
 0x130   :  { %2545 = vmatprep.subr.mxu1 %v2366_v36  ;;  %2522 = vmatpush3.msra.mxu0 %v2366_v36  ;;  %v323_v63 = vmax.f32 %v3369_v60, 1.0  ;;  %vm275_vm2 = vcmp.gt.f32.partialorder %v3369_v60, 0.0 }
 0x131   :  { %2553 = vmatpush3.msra.mxu1 %v2366_v36  ;;  %2523 = vmatprep.subr.mxu0 %v971_v40 }
 0x132   :  { %2546 = vmatprep.subr.mxu1 %v971_v40  ;;  %2524 = vmatpush3.msra.mxu0 %v971_v40 }
 0x133   :  { %2554 = vmatpush3.msra.mxu1 %v971_v40  ;;  %2525 = vmatprep.subr.mxu0 %v2363_v30  ;;  %v3376_v5 = vpop.xlane.xlu1 %172  ;;  %v453_v40 = vsel %vm261_vm4, %v2562_v26, 0.0 }
 0x134   :  { %2547 = vmatprep.subr.mxu1 %v2363_v30  ;;  %2526 = vmatpush3.msra.mxu0 %v2363_v30  ;;  %v325_v26 = vmax.f32 %v3376_v5, 1.0  ;;  %vm277_vm4 = vcmp.gt.f32.partialorder %v3376_v5, 0.0 }
 0x135   :  { %2555 = vmatpush3.msra.mxu1 %v2363_v30  ;;  %2527 = vmatprep.subr.mxu0 %v961_v34  ;;  %v450_v30 = vsel %vm258_vm3, %v2560_v16, 0.0 }
 0x136   :  { %2548 = vmatprep.subr.mxu1 %v961_v34  ;;  %2528 = vmatpush3.msra.mxu0 %v961_v34 }
 0x137   :  { %2556 = vmatpush3.msra.mxu1 %v961_v34  ;;  %2504 = vmatprep.mubr.msk.f32.mxu1 %vm113_vm1, %v3757_v12  ;;  %v3383_v15 = vpop.xlane.xlu1 %178 }
 0x138   :  { %2505 = vmatmul.mubr.msk.f32.gmra.mxu1 %vm113_vm1, %v3758_v28  ;;  %2530 = vmatmul.mubr.msk.f32.vlgmr.msra.gmra.mxu0 %vm113_vm1, %v3759_v33 }
 0x139   :  { %2507 = vmatprep.mubr.msk.f32.mxu1 %vm113_vm1, %v3760_v56 }
 0x13b   :  { %v3397_v45 = vpop.xlane.xlu1 %184 }
 0x13c   :  { %2508 = vmatmul.mubr.msk.f32.gmra.mxu1 %vm113_vm1, %v3761_v22 }
 0x13d   :  { %2510 = vmatprep.mubr.msk.f32.mxu1 %vm113_vm1, %v3762_v21  ;;  %v455_v21 = vsel %vm263_vm6, %v2566_v46, 0.0  ;;  %vm279_vm6 = vcmp.gt.f32.partialorder %v3383_v15, 0.0 }
 0x140   :  { %2511 = vmatmul.mubr.msk.f32.gmra.mxu1 %vm113_vm1, %v3763_v42 }
 0x141   :  { %2532 = vmatprep.mubr.msk.f32.mxu1 %vm113_vm1, %v3764_v13  ;;  %v321_v13 = vmax.f32 %v3364_v52, 1.0 }
 0x144   :  { %2533 = vmatmul.mubr.msk.f32.vlgmr.msra.gmra.mxu1 %vm113_vm1, %v3765_v18 }
 0x145   :  { %2535 = vmatprep.mubr.msk.f32.mxu1 %vm113_vm1, %v2116_v2  ;;  %v3346_v2 = vpop.xlane.xlu0 %127 }
 0x146   :  { %v310_v1 = vmax.f32 %v3346_v2, 1.0  ;;  %vm262_vm7 = vcmp.gt.f32.partialorder %v3346_v2, 0.0  ;;  %v3419_v2 = vpop.xlane.xlu1 %190 }
 0x148   :  { %2536 = vmatmul.mubr.msk.f32.gmra.mxu1 %vm113_vm1, %v2117_v57  ;;  %2567 = vrcp.f32 %v310_v1 }
 0x149   :  { %2538 = vmatprep.mubr.msk.f32.mxu1 %vm113_vm1, %v2120_v49  ;;  %v3350_v57 = vpop.xlane.xlu0 %133  ;;  %2569 = vrcp.f32 %v313_v4 }
 0x14a   :  { %v312_v6 = vmax.f32 %v3350_v57, 1.0  ;;  %vm264_vm9 = vcmp.gt.f32.partialorder %v3350_v57, 0.0 }
 0x14c   :  { %2539 = vmatmul.mubr.msk.f32.gmra.mxu1 %vm113_vm1, %v2121_v50  ;;  %2571 = vrcp.f32 %v312_v6 }
 0x14d   :  { %v3354_v49 = vpop.xlane.xlu0 %139  ;;  %2573 = vrcp.f32 %v315_v10 }
 0x14e   :  { %v314_v14 = vmax.f32 %v3354_v49, 1.0  ;;  %vm266_vm11 = vcmp.gt.f32.partialorder %v3354_v49, 0.0 }
 0x150   :  { %2575 = vrcp.f32 %v314_v14 }
 0x151   :  { %v3358_v50 = vpop.xlane.xlu0 %145  ;;  %2577 = vrcp.f32 %v317_v24 }
 0x152   :  { %v316_v34 = vmax.f32 %v3358_v50, 1.0  ;;  %vm268_vm13 = vcmp.gt.f32.partialorder %v3358_v50, 0.0 }
 0x154   :  { %2579 = vrcp.f32 %v316_v34 }
 0x155   :  { %v3362_v53 = vpop.xlane.xlu0 %151  ;;  %v2568_v33 = vpop.eup %2567  ;;  %2581 = vrcp.f32 %v319_v44 }
 0x156   :  { %v318_v12 = vmax.f32 %v3362_v53, 1.0  ;;  %v2570_v18 = vpop.eup %2569  ;;  %v454_v43 = vsel %vm262_vm7, %v2568_v33, 0.0  ;;  %vm270_vm15 = vcmp.gt.f32.partialorder %v3362_v53, 0.0 }
 0x157   :  { %v457_v58 = vsel %vm265_vm8, %v2570_v18, 0.0  ;;  %v329_v18 = vmax.f32 %v3397_v45, 1.0  ;;  %vm281_vm8 = vcmp.gt.f32.partialorder %v3397_v45, 0.0 }
 0x158   :  { %2583 = vrcp.f32 %v318_v12 }
 0x159   :  { %v3366_v54 = vpop.xlane.xlu0 %157  ;;  %v2572_v3 = vpop.eup %2571  ;;  %2585 = vrcp.f32 %v321_v13 }
 0x15a   :  { %v320_v47 = vmax.f32 %v3366_v54, 1.0  ;;  %v2574_v4 = vpop.eup %2573  ;;  %v456_v10 = vsel %vm264_vm9, %v2572_v3, 0.0  ;;  %vm272_vm1 = vcmp.gt.f32.partialorder %v3366_v54, 0.0 }
 0x15c   :  { %2587 = vrcp.f32 %v320_v47 }
 0x15d   :  { %v3372_v0 = vpop.xlane.xlu0 %163  ;;  %v2576_v16 = vpop.eup %2575  ;;  %2589 = vrcp.f32 %v323_v63  ;;  %v331_v63 = vmax.f32 %v3419_v2, 1.0 }
 0x15e   :  { %v322_v14 = vmax.f32 %v3372_v0, 1.0  ;;  %v458_v34 = vsel %vm266_vm11, %v2576_v16, 0.0  ;;  %vm274_vm3 = vcmp.gt.f32.partialorder %v3372_v0, 0.0 }
 0x160   :  { %2591 = vrcp.f32 %v322_v14 }
 0x161   :  { %v3379_v9 = vpop.xlane.xlu0 %169  ;;  %2593 = vrcp.f32 %v325_v26 }
 0x162   :  { %vm276_vm5 = vcmp.gt.f32.partialorder %v3379_v9, 0.0 }
 0x165   :  { %v3391_v25 = vpop.xlane.xlu0 %175 }
 0x166   :  { %v326_v33 = vmax.f32 %v3391_v25, 1.0  ;;  %vm278_vm7 = vcmp.gt.f32.partialorder %v3391_v25, 0.0 }
 0x169   :  { %v3405_v28 = vpop.xlane.xlu0 %181 }
 0x16a   :  { %v328_v3 = vmax.f32 %v3405_v28, 1.0  ;;  %vm280_vm9 = vcmp.gt.f32.partialorder %v3405_v28, 0.0 }
 0x16d   :  { %v3427_v1 = vpop.xlane.xlu0 %187 }
 0x16e   :  { %v330_v14 = vmax.f32 %v3427_v1, 1.0  ;;  %vm282_vm11 = vcmp.gt.f32.partialorder %v3427_v1, 0.0 }
 0x1a7   :  { %v2391_v20 = vpop.f32.mrf.mxu1 }
 0x1a8   :  { %v1775_v29 = vmul.f32 %v2391_v20, %v451_v19  ;;  %v459_v20 = vsel %vm267_vm10, %v2574_v4, 0.0  ;;  %vm283_vm10 = vcmp.gt.f32.partialorder %v3419_v2, 0.0 }
 0x1a9   :  { %v1090_v31 = vpop.f32.mrf.mxu1 }
 0x1aa   :  { %v1830_v36 = vadd.f32 %v3388_v23, %v1775_v29  ;;  %v1774_v39 = vmul.f32 %v1090_v31, %v450_v30  ;;  %v3441_v29 = vpop.xlane.xlu1 %196  ;;  %v2578_v30 = vpop.eup %2577 }
 0x1ab   :  { %v2394_v41 = vpop.f32.mrf.mxu1  ;;  %v461_v44 = vsel %vm269_vm12, %v2578_v30, 0.0  ;;  %v333_v26 = vmax.f32 %v3441_v29, 1.0  ;;  %vm285_vm12 = vcmp.gt.f32.partialorder %v3441_v29, 0.0 }
 0x1ac   :  { %1878 = vst [vmem:[%s3727_s4 + $0x8] sm:$0xff] %v1830_v36  ;;  %v1829_v51 = vadd.f32 %v3388_v23, %v1774_v39  ;;  %v1777_v61 = vmul.f32 %v2394_v41, %v453_v40  ;;  %v324_v36 = vmax.f32 %v3379_v9, 1.0  ;;  %v3449_v39 = vpop.xlane.xlu0 %193  ;;  %v2580_v40 = vpop.eup %2579 }
 0x1ad   :  { %v1100_v8 = vpop.f32.mrf.mxu1 }
 0x1ae   :  { %1877 = vst [vmem:[%s3727_s4] sm:$0xff] %v1829_v51  ;;  %v1832_v56 = vadd.f32 %v3388_v23, %v1777_v61  ;;  %v1776_v22 = vmul.f32 %v1100_v8, %v452_v62  ;;  %v327_v51 = vmax.f32 %v3383_v15, 1.0  ;;  %v2582_v61 = vpop.eup %2581  ;;  %2595 = vrcp.f32 %v324_v36 }
 0x1af   :  { %v2397_v42 = vpop.f32.mrf.mxu1  ;;  %v460_v8 = vsel %vm268_vm13, %v2580_v40, 0.0  ;;  %vm284_vm13 = vcmp.gt.f32.partialorder %v3449_v39, 0.0 }
 0x1b0   :  { %1880 = vst [vmem:[%s3727_s4 + $0x18] sm:$0xff] %v1832_v56  ;;  %v1831_v48 = vadd.f32 %v3388_v23, %v1776_v22  ;;  %v1779_v17 = vmul.f32 %v2397_v42, %v455_v21  ;;  %v3463_v56 = vpop.xlane.xlu1 %202  ;;  %v2584_v22 = vpop.eup %2583  ;;  %v463_v42 = vsel %vm271_vm14, %v2582_v61, 0.0  ;;  %2597 = vrcp.f32 %v327_v51 }
 0x1b1   :  { %v1110_v38 = vpop.f32.mrf.mxu1  ;;  %2599 = vrcp.f32 %v326_v33  ;;  %vm287_vm14 = vcmp.gt.f32.partialorder %v3463_v56, 0.0 }
 0x1b2   :  { %1879 = vst [vmem:[%s3727_s4 + $0x10] sm:$0xff] %v1831_v48  ;;  %v1834_v32 = vadd.f32 %v3388_v23, %v1779_v17  ;;  %v1778_v55 = vmul.f32 %v1110_v38, %v454_v43  ;;  %v3471_v48 = vpop.xlane.xlu0 %199  ;;  %v2586_v17 = vpop.eup %2585  ;;  %v462_v38 = vsel %vm270_vm15, %v2584_v22, 0.0  ;;  %2601 = vrcp.f32 %v329_v18 }
 0x1b3   :  { %v2400_v59 = vpop.f32.mrf.mxu1  ;;  %2603 = vrcp.f32 %v328_v3  ;;  %vm286_vm15 = vcmp.gt.f32.partialorder %v3471_v48, 0.0 }
 0x1b4   :  { %1882 = vst [vmem:[%s3727_s4 + $0x28] sm:$0xff] %v1834_v32  ;;  %v1833_v57 = vadd.f32 %v3388_v23, %v1778_v55  ;;  %v1781_v6 = vmul.f32 %v2400_v59, %v457_v58  ;;  %v2588_v32 = vpop.eup %2587  ;;  %v465_v58 = vsel %vm273_vm0, %v2586_v17, 0.0  ;;  %v3485_v4 = vpop.xlane.xlu1 %208  ;;  %2605 = vrcp.f32 %v331_v63 }
 0x1b5   :  { %v1120_v11 = vpop.f32.mrf.mxu1  ;;  %2607 = vrcp.f32 %v330_v14  ;;  %vm289_vm0 = vcmp.gt.f32.partialorder %v3485_v4, 0.0 }
 0x1b6   :  { %1881 = vst [vmem:[%s3727_s4 + $0x20] sm:$0xff] %v1833_v57  ;;  %v1836_v27 = vadd.f32 %v3388_v23, %v1781_v6  ;;  %v1780_v19 = vmul.f32 %v1120_v11, %v456_v10  ;;  %v2590_v57 = vpop.eup %2589  ;;  %v464_v10 = vsel %vm272_vm1, %v2588_v32, 0.0  ;;  %v3493_v16 = vpop.xlane.xlu0 %205  ;;  %2609 = vrcp.f32 %v333_v26 }
 0x1b7   :  { %v2419_v24 = vpop.f32.mrf.mxu1  ;;  %vm288_vm1 = vcmp.gt.f32.partialorder %v3493_v16, 0.0 }
 0x1b8   :  { %1884 = vst [vmem:[%s3727_s4 + $0x38] sm:$0xff] %v1836_v27  ;;  %v1835_v49 = vadd.f32 %v3388_v23, %v1780_v19  ;;  %v1783_v31 = vmul.f32 %v2419_v24, %v459_v20  ;;  %v2592_v27 = vpop.eup %2591  ;;  %v467_v20 = vsel %vm275_vm2, %v2590_v57, 0.0  ;;  %v3507_v36 = vpop.xlane.xlu1 %214 }
 0x1b9   :  { %v1219_v35 = vpop.f32.mrf.mxu1  ;;  %v2594_v30 = vpop.eup %2593  ;;  %v339_v63 = vmax.f32 %v3507_v36, 1.0  ;;  %vm291_vm2 = vcmp.gt.f32.partialorder %v3507_v36, 0.0 }
 0x1ba   :  { %1883 = vst [vmem:[%s3727_s4 + $0x30] sm:$0xff] %v1835_v49  ;;  %v1838_v7 = vadd.f32 %v3388_v23, %v1783_v31  ;;  %v1782_v41 = vmul.f32 %v1219_v35, %v458_v34  ;;  %v466_v31 = vsel %vm274_vm3, %v2592_v27, 0.0  ;;  %v332_v35 = vmax.f32 %v3449_v39, 1.0  ;;  %v3515_v51 = vpop.xlane.xlu0 %211 }
 0x1bb   :  { %v2422_v46 = vpop.f32.mrf.mxu1  ;;  %v2596_v40 = vpop.eup %2595  ;;  %v338_v14 = vmax.f32 %v3515_v51, 1.0  ;;  %vm290_vm3 = vcmp.gt.f32.partialorder %v3515_v51, 0.0 }
 0x1bc   :  { %1886 = vst [vmem:[%s3727_s4 + $0x48] sm:$0xff] %v1838_v7  ;;  %v1837_v50 = vadd.f32 %v3388_v23, %v1782_v41  ;;  %v1785_v62 = vmul.f32 %v2422_v46, %v461_v44  ;;  %v469_v41 = vsel %vm277_vm4, %v2594_v30, 0.0  ;;  %v335_v46 = vmax.f32 %v3463_v56, 1.0 }
 0x1bd   :  { %v1229_v12 = vpop.f32.mrf.mxu1  ;;  %v2598_v61 = vpop.eup %2597  ;;  %2611 = vrcp.f32 %v332_v35 }
 0x1be   :  { %1885 = vst [vmem:[%s3727_s4 + $0x40] sm:$0xff] %v1837_v50  ;;  %v1840_v37 = vadd.f32 %v3388_v23, %v1785_v62  ;;  %v1784_v21 = vmul.f32 %v1229_v12, %v460_v8  ;;  %v468_v62 = vsel %vm276_vm5, %v2596_v40, 0.0  ;;  %v334_v12 = vmax.f32 %v3471_v48, 1.0  ;;  %v2600_v33 = vpop.eup %2599 }
 0x1bf   :  { %v2425_v13 = vpop.f32.mrf.mxu1  ;;  %2613 = vrcp.f32 %v335_v46  ;;  %v2602_v18 = vpop.eup %2601 }
 0x1c0   :  { %1888 = vst [vmem:[%s3727_s4 + $0x58] sm:$0xff] %v1840_v37  ;;  %v1839_v53 = vadd.f32 %v3388_v23, %v1784_v21  ;;  %v1787_v43 = vmul.f32 %v2425_v13, %v463_v42  ;;  %v471_v37 = vsel %vm279_vm6, %v2598_v61, 0.0  ;;  %v337_v42 = vmax.f32 %v3485_v4, 1.0  ;;  %v3529_v13 = vpop.xlane.xlu1 %220  ;;  %v2604_v3 = vpop.eup %2603 }
 0x1c1   :  { %v1239_v47 = vpop.f32.mrf.mxu1  ;;  %2615 = vrcp.f32 %v334_v12  ;;  %v472_v57 = vsel %vm280_vm9, %v2604_v3, 0.0  ;;  %vm293_vm4 = vcmp.gt.f32.partialorder %v3529_v13, 0.0 }
 0x1c2   :  { %1887 = vst [vmem:[%s3727_s4 + $0x50] sm:$0xff] %v1839_v53  ;;  %v1842_v52 = vadd.f32 %v3388_v23, %v1787_v43  ;;  %v1786_v55 = vmul.f32 %v1239_v47, %v462_v38  ;;  %v470_v53 = vsel %vm278_vm7, %v2600_v33, 0.0  ;;  %v336_v38 = vmax.f32 %v3493_v16, 1.0  ;;  %v3537_v47 = vpop.xlane.xlu0 %217 }
 0x1c3   :  { %v2428_v59 = vpop.f32.mrf.mxu1  ;;  %2617 = vrcp.f32 %v337_v42  ;;  %vm292_vm6 = vcmp.gt.f32.partialorder %v3537_v47, 0.0 }
 0x1c4   :  { %1890 = vst [vmem:[%s3727_s4 + $0x68] sm:$0xff] %v1842_v52  ;;  %v1841_v54 = vadd.f32 %v3388_v23, %v1786_v55  ;;  %v1789_v6 = vmul.f32 %v2428_v59, %v465_v58  ;;  %v473_v52 = vsel %vm281_vm8, %v2602_v18, 0.0  ;;  %v2606_v58 = vpop.eup %2605  ;;  %2619 = vrcp.f32 %v336_v38 }
 0x1c5   :  { %v1249_v11 = vpop.f32.mrf.mxu1  ;;  %v475_v27 = vsel %vm283_vm10, %v2606_v58, 0.0  ;;  %2621 = vrcp.f32 %v339_v63  ;;  %v340_v38 = vmax.f32 %v3537_v47, 1.0 }
 0x1c6   :  { %1889 = vst [vmem:[%s3727_s4 + $0x60] sm:$0xff] %v1841_v54  ;;  %v1844_v60 = vadd.f32 %v3388_v23, %v1789_v6  ;;  %v1788_v19 = vmul.f32 %v1249_v11, %v464_v10  ;;  %v3550_v6 = vpop.xlane.xlu1 %226  ;;  %v2608_v10 = vpop.eup %2607  ;;  %2623 = vrcp.f32 %v338_v14 }
 0x1c7   :  { %v2447_v24 = vpop.f32.mrf.mxu1  ;;  %v474_v26 = vsel %vm282_vm11, %v2608_v10, 0.0  ;;  %vm295_vm8 = vcmp.gt.f32.partialorder %v3550_v6, 0.0 }
 0x1c8   :  { %1892 = vst [vmem:[%s3727_s4 + $0x78] sm:$0xff] %v1844_v60  ;;  %v1843_v0 = vadd.f32 %v3388_v23, %v1788_v19  ;;  %v1791_v49 = vmul.f32 %v2447_v24, %v467_v20  ;;  %v3558_v19 = vpop.xlane.xlu0 %223  ;;  %v2610_v20 = vpop.eup %2609 }
 0x1c9   :  { %v1348_v34 = vpop.f32.mrf.mxu1  ;;  %v342_v10 = vmax.f32 %v3558_v19, 1.0  ;;  %vm294_vm9 = vcmp.gt.f32.partialorder %v3558_v19, 0.0 }
 0x1ca   :  { %1891 = vst [vmem:[%s3727_s4 + $0x70] sm:$0xff] %v1843_v0  ;;  %v1846_v5 = vadd.f32 %v3388_v23, %v1791_v49  ;;  %v1790_v7 = vmul.f32 %v1348_v34, %v466_v31  ;;  %v2612_v0 = vpop.eup %2611  ;;  %v477_v31 = vsel %vm285_vm12, %v2610_v20, 0.0  ;;  %v3570_v35 = vpop.xlane.xlu1 %232 }
 0x1cb   :  { %v2450_v44 = vpop.f32.mrf.mxu1  ;;  %vm297_vm10 = vcmp.gt.f32.partialorder %v3570_v35, 0.0 }
 0x1cc   :  { %1894 = vst [vmem:[%s3727_s4 + $0x88] sm:$0xff] %v1846_v5  ;;  %v1845_v9 = vadd.f32 %v3388_v23, %v1790_v7  ;;  %v1793_v50 = vmul.f32 %v2450_v44, %v469_v41  ;;  %v2614_v40 = vpop.eup %2613  ;;  %v476_v7 = vsel %vm284_vm13, %v2612_v0, 0.0  ;;  %v3577_v44 = vpop.xlane.xlu0 %229 }
 0x1cd   :  { %v1358_v8 = vpop.f32.mrf.mxu1  ;;  %vm296_vm11 = vcmp.gt.f32.partialorder %v3577_v44, 0.0 }
 0x1ce   :  { %1893 = vst [vmem:[%s3727_s4 + $0x80] sm:$0xff] %v1845_v9  ;;  %v1848_v15 = vadd.f32 %v3388_v23, %v1793_v50  ;;  %v1792_v22 = vmul.f32 %v1358_v8, %v468_v62  ;;  %v2616_v46 = vpop.eup %2615  ;;  %v479_v9 = vsel %vm287_vm14, %v2614_v40, 0.0 }
 0x1cf   :  { %v2453_v21 = vpop.f32.mrf.mxu1  ;;  %v478_v48 = vsel %vm286_vm15, %v2616_v46, 0.0 }
 0x1d0   :  { %1896 = vst [vmem:[%s3727_s4 + $0x98] sm:$0xff] %v1848_v15  ;;  %v1847_v25 = vadd.f32 %v3388_v23, %v1792_v22  ;;  %v1795_v17 = vmul.f32 %v2453_v21, %v471_v37  ;;  %v2618_v62 = vpop.eup %2617  ;;  %v3589_v15 = vpop.xlane.xlu1 %238  ;;  %v341_v21 = vmax.f32 %v3529_v13, 1.0 }
 0x1d1   :  { %v1368_v43 = vpop.f32.mrf.mxu1  ;;  %v2620_v22 = vpop.eup %2619  ;;  %v481_v42 = vsel %vm289_vm0, %v2618_v62, 0.0  ;;  %vm299_vm5 = vcmp.gt.f32.partialorder %v3589_v15, 0.0 }
 0x1d2   :  { %1895 = vst [vmem:[%s3727_s4 + $0x90] sm:$0xff] %v1847_v25  ;;  %v1850_v45 = vadd.f32 %v3388_v23, %v1795_v17  ;;  %v1794_v32 = vmul.f32 %v1368_v43, %v470_v53  ;;  %v3597_v25 = vpop.xlane.xlu0 %235  ;;  %v347_v53 = vmax.f32 %v3589_v15, 1.0  ;;  %v2622_v43 = vpop.eup %2621  ;;  %v480_v3 = vsel %vm288_vm1, %v2620_v22, 0.0 }
 0x1d3   :  { %v2456_v55 = vpop.f32.mrf.mxu1  ;;  %v2624_v58 = vpop.eup %2623  ;;  %2625 = vrcp.f32 %v341_v21  ;;  %vm298_vm7 = vcmp.gt.f32.partialorder %v3597_v25, 0.0 }
 0x1d4   :  { %1898 = vst [vmem:[%s3727_s4 + $0xa8] sm:$0xff] %v1850_v45  ;;  %v1849_v59 = vadd.f32 %v3388_v23, %v1794_v32  ;;  %v1797_v28 = vmul.f32 %v2456_v55, %v473_v52  ;;  %v346_v55 = vmax.f32 %v3597_v25, 1.0  ;;  %2627 = vrcp.f32 %v347_v53 }
 0x1d5   :  { %v1378_v54 = vpop.f32.mrf.mxu1  ;;  %2629 = vrcp.f32 %v340_v38  ;;  %v482_v51 = vsel %vm290_vm3, %v2624_v58, 0.0 }
 0x1d6   :  { %1897 = vst [vmem:[%s3727_s4 + $0xa0] sm:$0xff] %v1849_v59  ;;  %v1852_v2 = vadd.f32 %v3388_v23, %v1797_v28  ;;  %v1796_v11 = vmul.f32 %v1378_v54, %v472_v57  ;;  %v343_v59 = vmax.f32 %v3550_v6, 1.0  ;;  %v483_v28 = vsel %vm291_vm2, %v2622_v43, 0.0  ;;  %v3617_v54 = vpop.xlane.xlu1 %244 }
 0x1d7   :  { %v2475_v60 = vpop.f32.mrf.mxu1  ;;  %2631 = vrcp.f32 %v346_v55  ;;  %vm301_vm12 = vcmp.gt.f32.partialorder %v3617_v54, 0.0 }
 0x1d8   :  { %1900 = vst [vmem:[%s3727_s4 + $0xb8] sm:$0xff] %v1852_v2  ;;  %v1851_v1 = vadd.f32 %v3388_v23, %v1796_v11  ;;  %v1799_v24 = vmul.f32 %v2475_v60, %v475_v27  ;;  %v3624_v27 = vpop.xlane.xlu0 %241  ;;  %2633 = vrcp.f32 %v343_v59  ;;  %v345_v60 = vmax.f32 %v3570_v35, 1.0 }
 0x1d9   :  { %v1477_v30 = vpop.f32.mrf.mxu1  ;;  %2635 = vrcp.f32 %v342_v10  ;;  %v348_v0 = vmax.f32 %v3624_v27, 1.0  ;;  %vm300_vm13 = vcmp.gt.f32.partialorder %v3624_v27, 0.0 }
 0x1da   :  { %1899 = vst [vmem:[%s3727_s4 + $0xb0] sm:$0xff] %v1851_v1  ;;  %v1854_v49 = vadd.f32 %v3388_v23, %v1799_v24  ;;  %v1798_v29 = vmul.f32 %v1477_v30, %v474_v26  ;;  %v344_v1 = vmax.f32 %v3577_v44, 1.0  ;;  %v3635_v24 = vpop.xlane.xlu1 %250  ;;  %2637 = vrcp.f32 %v345_v60 }
 0x1db   :  { %v2478_v34 = vpop.f32.mrf.mxu1  ;;  %v349_v26 = vmax.f32 %v3617_v54, 1.0  ;;  %vm303_vm14 = vcmp.gt.f32.partialorder %v3635_v24, 0.0 }
 0x1dc   :  { %1902 = vst [vmem:[%s3727_s4 + $0xc8] sm:$0xff] %v1854_v49  ;;  %v1853_v39 = vadd.f32 %v3388_v23, %v1798_v29  ;;  %v1801_v5 = vmul.f32 %v2478_v34, %v477_v31  ;;  %v3638_v30 = vpop.xlane.xlu0 %247  ;;  %2639 = vrcp.f32 %v344_v1  ;;  %v351_v29 = vmax.f32 %v3635_v24, 1.0 }
 0x1dd   :  { %v1487_v41 = vpop.f32.mrf.mxu1  ;;  %2641 = vrcp.f32 %v349_v26  ;;  %vm302_vm15 = vcmp.gt.f32.partialorder %v3638_v30, 0.0 }
 0x1de   :  { %1901 = vst [vmem:[%s3727_s4 + $0xc0] sm:$0xff] %v1853_v39  ;;  %v1856_v56 = vadd.f32 %v3388_v23, %v1801_v5  ;;  %v1800_v61 = vmul.f32 %v1487_v41, %v476_v7  ;;  %v3644_v34 = vpop.xlane.xlu1 %256  ;;  %2643 = vrcp.f32 %v348_v0  ;;  %v350_v39 = vmax.f32 %v3638_v30, 1.0 }
 0x1df   :  { %v2481_v50 = vpop.f32.mrf.mxu1  ;;  %2645 = vrcp.f32 %v351_v29  ;;  %v353_v13 = vmax.f32 %v3644_v34, 1.0  ;;  %vm305_vm0 = vcmp.gt.f32.partialorder %v3644_v34, 0.0 }
 0x1e0   :  { %1904 = vst [vmem:[%s3727_s4 + $0xd8] sm:$0xff] %v1856_v56  ;;  %v1855_v8 = vadd.f32 %v3388_v23, %v1800_v61  ;;  %v1803_v12 = vmul.f32 %v2481_v50, %v479_v9  ;;  %v2626_v49 = vpop.eup %2625  ;;  %v3649_v7 = vpop.xlane.xlu0 %253  ;;  %2647 = vrcp.f32 %v350_v39 }
 0x1e1   :  { %v1497_v33 = vpop.f32.mrf.mxu1  ;;  %v2628_v31 = vpop.eup %2627  ;;  %v485_v41 = vsel %vm293_vm4, %v2626_v49, 0.0  ;;  %2649 = vrcp.f32 %v353_v13  ;;  %vm304_vm1 = vcmp.gt.f32.partialorder %v3649_v7, 0.0 }
 0x1e2   :  { %1903 = vst [vmem:[%s3727_s4 + $0xd0] sm:$0xff] %v1855_v8  ;;  %v1858_v4 = vadd.f32 %v3388_v23, %v1803_v12  ;;  %v1802_v37 = vmul.f32 %v1497_v33, %v478_v48  ;;  %v2630_v40 = vpop.eup %2629  ;;  %v491_v56 = vsel %vm299_vm5, %v2628_v31, 0.0  ;;  %v352_v12 = vmax.f32 %v3649_v7, 1.0 }
 0x1e3   :  { %v2484_v18 = vpop.f32.mrf.mxu1  ;;  %v484_v8 = vsel %vm292_vm6, %v2630_v40, 0.0 }
 0x1e4   :  { %1906 = vst [vmem:[%s3727_s4 + $0xe8] sm:$0xff] %v1858_v4  ;;  %v1857_v17 = vadd.f32 %v3388_v23, %v1802_v37  ;;  %v1805_v16 = vmul.f32 %v2484_v18, %v481_v42  ;;  %v2632_v5 = vpop.eup %2631  ;;  %2651 = vrcp.f32 %v352_v12 }
 0x1e5   :  { %v1507_v45 = vpop.f32.mrf.mxu1  ;;  %v2634_v9 = vpop.eup %2633  ;;  %v490_v48 = vsel %vm298_vm7, %v2632_v5, 0.0 }
 0x1e6   :  { %1905 = vst [vmem:[%s3727_s4 + $0xe0] sm:$0xff] %v1857_v17  ;;  %v1860_v32 = vadd.f32 %v3388_v23, %v1805_v16  ;;  %v1804_v52 = vmul.f32 %v1507_v45, %v480_v3  ;;  %v2636_v15 = vpop.eup %2635  ;;  %v487_v21 = vsel %vm295_vm8, %v2634_v9, 0.0 }
 0x1e7   :  { %v2638_v18 = vpop.eup %2637  ;;  %v486_v53 = vsel %vm294_vm9, %v2636_v15, 0.0 }
 0x1e8   :  { %1908 = vst [vmem:[%s3727_s4 + $0xf8] sm:$0xff] %v1860_v32  ;;  %v1859_v36 = vadd.f32 %v3388_v23, %v1804_v52  ;;  %v2503_v63 = vpop.f32.mrf.mxu1  ;;  %v489_v45 = vsel %vm297_vm10, %v2638_v18, 0.0 }
 0x1e9   :  { %v1807_v57 = vmul.f32 %v2503_v63, %v483_v28  ;;  %v2640_v38 = vpop.eup %2639 }
 0x1ea   :  { %1907 = vst [vmem:[%s3727_s4 + $0xf0] sm:$0xff] %v1859_v36  ;;  %v1606_v2 = vpop.f32.mrf.mxu1  ;;  %v2642_v19 = vpop.eup %2641  ;;  %v488_v55 = vsel %vm296_vm11, %v2640_v38, 0.0 }
 0x1eb   :  { %v1862_v11 = vadd.f32 %v3388_v23, %v1807_v57  ;;  %v1806_v14 = vmul.f32 %v1606_v2, %v482_v51  ;;  %v2644_v59 = vpop.eup %2643  ;;  %v493_v63 = vsel %vm301_vm12, %v2642_v19, 0.0 }
 0x1ec   :  { %v2646_v54 = vpop.eup %2645  ;;  %v492_v2 = vsel %vm300_vm13, %v2644_v59, 0.0 }
 0x1ed   :  { %1910 = vst [vmem:[%s3727_s4 + $0x108] sm:$0xff] %v1862_v11  ;;  %v1861_v20 = vadd.f32 %v3388_v23, %v1806_v14  ;;  %v2648_v14 = vpop.eup %2647 }
 0x1ee   :  { %v2650_v24 = vpop.eup %2649  ;;  %v494_v30 = vsel %vm302_vm15, %v2648_v14, 0.0 }
 0x1ef   :  { %1909 = vst [vmem:[%s3727_s4 + $0x100] sm:$0xff] %v1861_v20  ;;  %v495_v20 = vsel %vm303_vm14, %v2646_v54, 0.0  ;;  %v497_v34 = vsel %vm305_vm0, %v2650_v24, 0.0 }
 0x1f1   :  { %v2652_v29 = vpop.eup %2651 }
 0x1f8   :  { %v2506_v46 = vpop.f32.mrf.mxu1  ;;  %v2531_v61 = vpop.f32.mrf.mxu0 }
 0x1f9   :  { %v1809_v50 = vmul.f32 %v2506_v46, %v485_v41  ;;  %v1815_v62 = vmul.f32 %v2531_v61, %v491_v56  ;;  %v496_v46 = vsel %vm304_vm1, %v2652_v29, 0.0 }
 0x1fa   :  { %v1616_v47 = vpop.f32.mrf.mxu1  ;;  %v1735_v33 = vpop.f32.mrf.mxu0 }
 0x1fb   :  { %v1864_v22 = vadd.f32 %v3388_v23, %v1809_v50  ;;  %v1808_v4 = vmul.f32 %v1616_v47, %v484_v8  ;;  %v1870_v37 = vadd.f32 %v3388_v23, %v1815_v62  ;;  %v1814_v6 = vmul.f32 %v1735_v33, %v490_v48 }
 0x1fc   :  { %v2509_v42 = vpop.f32.mrf.mxu1 }
 0x1fd   :  { %1912 = vst [vmem:[%s3727_s4 + $0x118] sm:$0xff] %v1864_v22  ;;  %v1863_v25 = vadd.f32 %v3388_v23, %v1808_v4  ;;  %v1811_v17 = vmul.f32 %v2509_v42, %v487_v21  ;;  %1918 = vst [vmem:[%s3727_s4 + $0x148] sm:$0xff] %v1870_v37  ;;  %v1869_v16 = vadd.f32 %v3388_v23, %v1814_v6 }
 0x1fe   :  { %v1626_v43 = vpop.f32.mrf.mxu1 }
 0x1ff   :  { %1911 = vst [vmem:[%s3727_s4 + $0x110] sm:$0xff] %v1863_v25  ;;  %v1866_v35 = vadd.f32 %v3388_v23, %v1811_v17  ;;  %v1810_v3 = vmul.f32 %v1626_v43, %v486_v53  ;;  %1917 = vst [vmem:[%s3727_s4 + $0x140] sm:$0xff] %v1869_v16 }
 0x200   :  { %v2512_v32 = vpop.f32.mrf.mxu1 }
 0x201   :  { %1914 = vst [vmem:[%s3727_s4 + $0x128] sm:$0xff] %v1866_v35  ;;  %v1865_v44 = vadd.f32 %v3388_v23, %v1810_v3  ;;  %v1813_v52 = vmul.f32 %v2512_v32, %v489_v45 }
 0x202   :  { %v1636_v58 = vpop.f32.mrf.mxu1 }
 0x203   :  { %1913 = vst [vmem:[%s3727_s4 + $0x120] sm:$0xff] %v1865_v44  ;;  %v1868_v36 = vadd.f32 %v3388_v23, %v1813_v52  ;;  %v1812_v28 = vmul.f32 %v1636_v58, %v488_v55 }
 0x204   :  { %v2534_v57 = vpop.f32.mrf.mxu1 }
 0x205   :  { %1916 = vst [vmem:[%s3727_s4 + $0x138] sm:$0xff] %v1868_v36  ;;  %v1867_v10 = vadd.f32 %v3388_v23, %v1812_v28  ;;  %v1817_v51 = vmul.f32 %v2534_v57, %v493_v63 }
 0x206   :  { %v1745_v11 = vpop.f32.mrf.mxu1 }
 0x207   :  { %1915 = vst [vmem:[%s3727_s4 + $0x130] sm:$0xff] %v1867_v10  ;;  %v1872_v27 = vadd.f32 %v3388_v23, %v1817_v51  ;;  %v1816_v60 = vmul.f32 %v1745_v11, %v492_v2 }
 0x208   :  { %v2537_v1 = vpop.f32.mrf.mxu1 }
 0x209   :  { %1920 = vst [vmem:[%s3727_s4 + $0x158] sm:$0xff] %v1872_v27  ;;  %v1871_v26 = vadd.f32 %v3388_v23, %v1816_v60  ;;  %v1819_v0 = vmul.f32 %v2537_v1, %v495_v20 }
 0x20a   :  { %v1755_v49 = vpop.f32.mrf.mxu1 }
 0x20b   :  { %1919 = vst [vmem:[%s3727_s4 + $0x150] sm:$0xff] %v1871_v26  ;;  %v1874_v31 = vadd.f32 %v3388_v23, %v1819_v0  ;;  %v1818_v40 = vmul.f32 %v1755_v49, %v494_v30 }
 0x20c   :  { %v2540_v39 = vpop.f32.mrf.mxu1 }
 0x20d   :  { %1922 = vst [vmem:[%s3727_s4 + $0x168] sm:$0xff] %v1874_v31  ;;  %v1873_v5 = vadd.f32 %v3388_v23, %v1818_v40  ;;  %v1821_v41 = vmul.f32 %v2540_v39, %v497_v34 }
 0x20e   :  { %v1765_v13 = vpop.f32.mrf.mxu1 }
 0x20f   :  { %1921 = vst [vmem:[%s3727_s4 + $0x160] sm:$0xff] %v1873_v5  ;;  %v1876_v7 = vadd.f32 %v3388_v23, %v1821_v41  ;;  %v1820_v56 = vmul.f32 %v1765_v13, %v496_v46 }
 0x211   :  { %1924 = vst [vmem:[%s3727_s4 + $0x178] sm:$0xff] %v1876_v7  ;;  %v1875_v61 = vadd.f32 %v3388_v23, %v1820_v56 }
 0x213   :  { %1923 = vst [vmem:[%s3727_s4 + $0x170] sm:$0xff] %v1875_v61 }

</bundles_post_ra>
